<compile_context>
chip_gen: v7x
topology: tpu7x:2x2x1
jax: 0.10.0
libtpu: 0.0.40
codegen_flags: <defaults>
</compile_context>

<pallas_src>
import functools
import math

import jax
import jax.numpy as jnp
from jax.experimental import pallas as pl
from jax.experimental.pallas import tpu as pltpu


def styled_conv_block_kernel(x_ref, noise_ref, w_ref, aff_ref, out_ref, *, L):
    x = x_ref[...]            # (Cin_p, N)  N = Bblk*L, batch folded onto lanes
    noise = noise_ref[...]    # (1, N)
    w_all = w_ref[...]        # (2, Cout, Wk): [conv1 | conv2] packed weights

    Cin_p, N = x.shape
    Cout = out_ref.shape[0]
    Bblk = N // L

    # This step's packed per-channel / per-sample params: (Cout, Bblk, 8) with
    # last-dim order [b1 | nw1 | b2 | nw2 | gamma1 | beta1 | gamma2 | beta2].
    aff = aff_ref[:, pl.ds(pl.program_id(0) * Bblk, Bblk), :]
    b1, nw1, b2, nw2 = (aff[:, 0, i:i + 1] for i in range(4))      # (Cout, 1)
    g1, be1, g2, be2 = (aff[:, :, i:i + 1] for i in range(4, 8))   # (Cout, Bblk, 1)

    w1 = w_all[0, :, : 3 * Cin_p]     # (Cout, 3*Cin_p)
    w2 = w_all[1, :, : 3 * Cout]      # (Cout, 3*Cout)

    # Per-sample conv boundary masks, hoisted once and shared by both convs.
    col = jax.lax.broadcasted_iota(jnp.int32, (1, N), 1)
    lane = (col & (L - 1)) if (L & (L - 1)) == 0 else (col % L)
    is_left = lane == 0
    is_right = lane == (L - 1)

    def conv3(h, w, b):
        # h: (C, N); w: (Cout, 3*C) rows ordered [tap k=0 | k=1 | k=2]; b: (Cout,1)
        # Cross-correlation with padding=1, applied per L-long sample segment:
        #   out[:, l] = w_k0 @ h[:, l-1] + w_k1 @ h[:, l] + w_k2 @ h[:, l+1]
        h_m1 = jnp.where(is_left, 0.0, pltpu.roll(h, 1, axis=1))        # h[:, l-1]
        h_p1 = jnp.where(is_right, 0.0, pltpu.roll(h, N - 1, axis=1))   # h[:, l+1]
        h_cat = jnp.concatenate([h_m1, h, h_p1], axis=0)                # (3C, N)
        return jnp.dot(w, h_cat, preferred_element_type=jnp.float32) + b

    def leaky(h):
        return jnp.maximum(h, 0.2 * h)

    def inorm_affine(h, gamma, beta):
        # InstanceNorm1d over each per-sample L-segment (biased var, eps=1e-5)
        # + style affine.  gamma/beta: (Cout, Bblk, 1).
        hs = h.reshape(Cout, Bblk, L)
        mu = jnp.mean(hs, axis=2, keepdims=True)
        msq = jnp.mean(hs * hs, axis=2, keepdims=True)
        var = jnp.maximum(msq - mu * mu, 0.0)        # one-pass biased variance
        hn = (hs - mu) * jax.lax.rsqrt(var + 1e-5)
        return (gamma * hn + beta).reshape(Cout, N)

    h = conv3(x, w1, b1)
    h = h + nw1 * noise                  # NoiseInjection (EqualLR'd weight)
    h = leaky(h)
    h = inorm_affine(h, g1, be1)

    h = conv3(h, w2, b2)
    h = h + nw2 * noise
    h = leaky(h)
    h = inorm_affine(h, g2, be2)

    out_ref[...] = h.astype(out_ref.dtype)


def _num_batch_blocks(B):
    """1 grid step on single-TC chips (v5e/v6e); 2 parallel steps on v7x."""
    try:
        kind = jax.devices()[0].device_kind.lower()
    except Exception:
        kind = ""
    if "v7" in kind and B >= 2 and B % 2 == 0:
        return 2
    return 1


def styled_conv_block(x_ncl, style, noise_n1l, kp):
    """x_ncl: (B, Cin, L); style: (B, S); noise_n1l: (B, 1, L) -> (B, Cout, L)."""
    B, Cin, L = x_ncl.shape
    _, Cout, Wk = kp["w"].shape
    Cin_p = kp["cin_p"]
    assert L % 128 == 0, "demo keeps per-sample length lane-aligned"

    # Hoisted AdaIN style projection: one batched (B,S)@(S,4*Cout) XLA GEMM.
    # Columns are per-channel interleaved [g1,b1,g2,b2] -> plain reshape.
    gb = (style @ kp["style_w"] + kp["style_b"]).reshape(B, Cout, 4)
    gb_cb = jnp.transpose(gb, (1, 0, 2))                         # (Cout, B, 4)
    consts_cb = jnp.broadcast_to(kp["consts"][:, None, :], (Cout, B, 4))
    aff = jnp.concatenate([consts_cb, gb_cb], axis=2)            # (Cout, B, 8)

    # Fold batch onto the lane axis (channels stay on sublanes); pad Cin -> 8.
    x_p = jnp.pad(x_ncl, ((0, 0), (0, Cin_p - Cin), (0, 0)))
    x_packed = jnp.transpose(x_p, (1, 0, 2)).reshape(Cin_p, B * L)
    noise_packed = jnp.transpose(noise_n1l, (1, 0, 2)).reshape(1, B * L)

    n_blocks = _num_batch_blocks(B)
    Bblk = B // n_blocks
    N = Bblk * L

    out_flat = pl.pallas_call(
        functools.partial(styled_conv_block_kernel, L=L),
        out_shape=jax.ShapeDtypeStruct((Cout, B * L), jnp.float32),
        grid=(n_blocks,),
        in_specs=[
            pl.BlockSpec((Cin_p, N), lambda b: (0, b)),
            pl.BlockSpec((1, N), lambda b: (0, b)),
            pl.BlockSpec((2, Cout, Wk), lambda b: (0, 0, 0)),
            pl.BlockSpec((Cout, B, 8), lambda b: (0, 0, 0)),
        ],
        out_specs=pl.BlockSpec((Cout, N), lambda b: (0, b)),
        compiler_params=pltpu.CompilerParams(
            dimension_semantics=("parallel",)),
    )(x_packed, noise_packed, kp["w"], aff)

    return jnp.transpose(out_flat.reshape(Cout, B, L), (1, 0, 2))


# ---------------- parameter construction (deterministic, mirrors __init__) ----------------
def make_params(key, Cin, Cout, S, K=3):
    assert Cout % 8 == 0, "demo assumes out_channel is a sublane multiple"
    ks = jax.random.split(key, 6)
    raw = {
        # EqualConv1d: weight ~ N(0,1), bias = 0 ; EqualLR scale sqrt(2 / (Cin*K))
        "w1_raw": jax.random.normal(ks[0], (Cout, Cin, K), jnp.float32),
        "w2_raw": jax.random.normal(ks[1], (Cout, Cout, K), jnp.float32),
        "b1_raw": jnp.zeros((Cout,), jnp.float32),
        "b2_raw": jnp.zeros((Cout,), jnp.float32),
        # NoiseInjection weight is zeros(1,C,1) in the module init; use nonzero
        # values here so the noise path is exercised by the parity check.
        "nw1_raw": jax.random.normal(ks[2], (1, Cout, 1), jnp.float32),
        "nw2_raw": jax.random.normal(ks[3], (1, Cout, 1), jnp.float32),
        # AdaIN style = EqualLinear(S, 2C): weight ~ N(0,1), bias = [1]*C ++ [0]*C
        "a1w_raw": jax.random.normal(ks[4], (2 * Cout, S), jnp.float32),
        "a2w_raw": jax.random.normal(ks[5], (2 * Cout, S), jnp.float32),
        "a1b_raw": jnp.concatenate([jnp.ones((Cout,)), jnp.zeros((Cout,))]).astype(jnp.float32),
        "a2b_raw": jnp.concatenate([jnp.ones((Cout,)), jnp.zeros((Cout,))]).astype(jnp.float32),
    }
    s_c1 = math.sqrt(2.0 / (Cin * K))
    s_c2 = math.sqrt(2.0 / (Cout * K))
    s_n = math.sqrt(2.0 / Cout)
    s_s = math.sqrt(2.0 / S)

    Cin_p = -(-Cin // 8) * 8   # conv1 input channels padded to a sublane tile

    def conv_w_2d(w_raw, scale, c_pad):
        # (Cout, Ci, K) -> (Cout, K*c_pad), columns ordered [tap0 | tap1 | tap2]
        # to match the kernel's h_cat = [h_m1 ; h ; h_p1] (c_pad rows per tap).
        Co, Ci, Kk = w_raw.shape
        w = jnp.transpose(w_raw * scale, (0, 2, 1))              # (Co, K, Ci)
        w = jnp.pad(w, ((0, 0), (0, 0), (0, c_pad - Ci)))
        return w.reshape(Co, Kk * c_pad)

    w1_2d = conv_w_2d(raw["w1_raw"], s_c1, Cin_p)                # (Cout, 3*Cin_p)
    w2_2d = conv_w_2d(raw["w2_raw"], s_c2, Cout)                 # (Cout, 3*Cout)
    Wk = max(w1_2d.shape[1], w2_2d.shape[1])
    pad_w = lambda w: jnp.pad(w, ((0, 0), (0, Wk - w.shape[1])))
    w_pack = jnp.stack([pad_w(w1_2d), pad_w(w2_2d)], axis=0)     # (2, Cout, Wk)

    # Shared per-channel constants packed: [b1 | nw1 | b2 | nw2].
    consts = jnp.stack([
        raw["b1_raw"], (raw["nw1_raw"] * s_n)[0, :, 0],
        raw["b2_raw"], (raw["nw2_raw"] * s_n)[0, :, 0]], axis=1)  # (Cout, 4)

    # Fused style projection, per-channel interleaved: column c*4 + p is
    # [gamma1_c, beta1_c, gamma2_c, beta2_c].
    def halves(w_raw):
        wt = (w_raw * s_s).T                                      # (S, 2*Cout)
        return wt[:, :Cout], wt[:, Cout:]
    g1w, b1w = halves(raw["a1w_raw"])
    g2w, b2w = halves(raw["a2w_raw"])
    style_w = jnp.stack([g1w, b1w, g2w, b2w], axis=2).reshape(S, 4 * Cout)
    style_b = jnp.stack([
        raw["a1b_raw"][:Cout], raw["a1b_raw"][Cout:],
        raw["a2b_raw"][:Cout], raw["a2b_raw"][Cout:]], axis=1).reshape(4 * Cout)

    kp = {"w": w_pack, "consts": consts, "style_w": style_w, "style_b": style_b,
          "cin_p": Cin_p}
    scales = {"c1": s_c1, "c2": s_c2, "n": s_n, "s": s_s}
    return raw, kp, scales


# ---------------- pure-JAX reference (mirrors PyTorch semantics) ----------------
def ref_forward(x, style, noise, raw, scales):
    def conv(h, w):
        return jax.lax.conv_general_dilated(
            h, w, window_strides=(1,), padding=((1, 1),),
            dimension_numbers=("NCH", "OIH", "NCH"))

    def adain(h, aw, ab):
        s = style @ (aw * scales["s"]).T + ab          # (B, 2C)
        C = h.shape[1]
        gamma = s[:, :C][:, :, None]
        beta = s[:, C:][:, :, None]
        mu = h.mean(axis=2, keepdims=True)
        var = ((h - mu) ** 2).mean(axis=2, keepdims=True)
        return gamma * (h - mu) / jnp.sqrt(var + 1e-5) + beta

    h = conv(x, raw["w1_raw"] * scales["c1"]) + raw["b1_raw"][None, :, None]
    h = h + (raw["nw1_raw"] * scales["n"]) * noise
    h = jnp.where(h >= 0, h, 0.2 * h)
    h = adain(h, raw["a1w_raw"], raw["a1b_raw"])
    h = conv(h, raw["w2_raw"] * scales["c2"]) + raw["b2_raw"][None, :, None]
    h = h + (raw["nw2_raw"] * scales["n"]) * noise
    h = jnp.where(h >= 0, h, 0.2 * h)
    h = adain(h, raw["a2w_raw"], raw["a2b_raw"])
    return h


if __name__ == "__main__":
    # L = 128 so every lane block is a full 128-wide store; batch folds onto lanes.
    B, Cin, Cout, L, S = 2, 4, 8, 128, 32

    key = jax.random.PRNGKey(0)
    kx, kstyle, knoise, kparam = jax.random.split(key, 4)

    x = jax.random.normal(kx, (B, Cin, L), jnp.float32)       # NCW, as PyTorch
    style = jax.random.normal(kstyle, (B, S), jnp.float32)
    noise = jax.random.normal(knoise, (B, 1, L), jnp.float32)

    raw, kp, scales = make_params(kparam, Cin, Cout, S)

    out = styled_conv_block(x, style, noise, kp)
    out = jax.block_until_ready(out)

    ref = ref_forward(x, style, noise, raw, scales)
    assert out.shape == (B, Cout, L)
    assert jnp.allclose(out, ref, rtol=1e-4, atol=1e-4), (
        f"max abs err = {jnp.max(jnp.abs(out - ref))}")

    print("KERNEL_OK")
</pallas_src>

<mosaic_0001>
module attributes {stable_mosaic.version = 11 : i64} {
  func.func @styled_conv_block_kernel(%arg0: i32, %arg1: memref<8x256xf32, #tpu.memory_space<vmem>>, %arg2: memref<1x256xf32, #tpu.memory_space<vmem>>, %arg3: memref<2x8x24xf32, #tpu.memory_space<vmem>>, %arg4: memref<8x2x8xf32, #tpu.memory_space<vmem>>, %arg5: memref<8x256xf32, #tpu.memory_space<vmem>>) attributes {dimension_semantics = [#tpu.dimension_semantics<parallel>], iteration_bounds = array<i64: 1>, scalar_prefetch = 0 : i64, scratch_operands = 0 : i64, tpu.core_type = #tpu.core_type<tc>, window_params = [{transform_indices = @transform_0, window_bounds = array<i64: 8, 256>}, {transform_indices = @transform_1, window_bounds = array<i64: 1, 256>}, {pipeline_mode = #tpu.pipeline_mode<synchronous>, transform_indices = @transform_2, window_bounds = array<i64: 2, 8, 24>}, {pipeline_mode = #tpu.pipeline_mode<synchronous>, transform_indices = @transform_3, window_bounds = array<i64: 8, 2, 8>}, {transform_indices = @transform_4, window_bounds = array<i64: 8, 256>}]} {
    %c0 = arith.constant 0 : index
    %c0_0 = arith.constant 0 : index
    %0 = vector.load %arg1[%c0, %c0_0] : memref<8x256xf32, #tpu.memory_space<vmem>>, vector<8x256xf32>
    %c0_1 = arith.constant 0 : index
    %c0_2 = arith.constant 0 : index
    %1 = vector.load %arg2[%c0_1, %c0_2] : memref<1x256xf32, #tpu.memory_space<vmem>>, vector<1x256xf32>
    %c0_3 = arith.constant 0 : index
    %c0_4 = arith.constant 0 : index
    %c0_5 = arith.constant 0 : index
    %2 = vector.load %arg3[%c0_3, %c0_4, %c0_5] : memref<2x8x24xf32, #tpu.memory_space<vmem>>, vector<2x8x24xf32>
    %c2_i32 = arith.constant 2 : i32
    %3 = arith.muli %arg0, %c2_i32 : i32
    %c0_6 = arith.constant 0 : index
    %4 = arith.index_cast %3 : i32 to index
    %c0_7 = arith.constant 0 : index
    %5 = vector.load %arg4[%c0_6, %4, %c0_7] : memref<8x2x8xf32, #tpu.memory_space<vmem>>, vector<8x2x8xf32>
    %6 = vector.extract_strided_slice %5 {offsets = [0, 0, 0], sizes = [8, 1, 1], strides = [1, 1, 1]} : vector<8x2x8xf32> to vector<8x1x1xf32>
    %7 = vector.shape_cast %6 : vector<8x1x1xf32> to vector<8x1xf32>
    %8 = vector.extract_strided_slice %5 {offsets = [0, 0, 1], sizes = [8, 1, 1], strides = [1, 1, 1]} : vector<8x2x8xf32> to vector<8x1x1xf32>
    %9 = vector.shape_cast %8 : vector<8x1x1xf32> to vector<8x1xf32>
    %10 = vector.extract_strided_slice %5 {offsets = [0, 0, 2], sizes = [8, 1, 1], strides = [1, 1, 1]} : vector<8x2x8xf32> to vector<8x1x1xf32>
    %11 = vector.shape_cast %10 : vector<8x1x1xf32> to vector<8x1xf32>
    %12 = vector.extract_strided_slice %5 {offsets = [0, 0, 3], sizes = [8, 1, 1], strides = [1, 1, 1]} : vector<8x2x8xf32> to vector<8x1x1xf32>
    %13 = vector.shape_cast %12 : vector<8x1x1xf32> to vector<8x1xf32>
    %14 = vector.extract_strided_slice %5 {offsets = [0, 0, 4], sizes = [8, 2, 1], strides = [1, 1, 1]} : vector<8x2x8xf32> to vector<8x2x1xf32>
    %15 = vector.extract_strided_slice %5 {offsets = [0, 0, 5], sizes = [8, 2, 1], strides = [1, 1, 1]} : vector<8x2x8xf32> to vector<8x2x1xf32>
    %16 = vector.extract_strided_slice %5 {offsets = [0, 0, 6], sizes = [8, 2, 1], strides = [1, 1, 1]} : vector<8x2x8xf32> to vector<8x2x1xf32>
    %17 = vector.extract_strided_slice %5 {offsets = [0, 0, 7], sizes = [8, 2, 1], strides = [1, 1, 1]} : vector<8x2x8xf32> to vector<8x2x1xf32>
    %18 = vector.extract_strided_slice %2 {offsets = [0, 0, 0], sizes = [1, 8, 24], strides = [1, 1, 1]} : vector<2x8x24xf32> to vector<1x8x24xf32>
    %19 = vector.shape_cast %18 : vector<1x8x24xf32> to vector<8x24xf32>
    %20 = vector.extract_strided_slice %2 {offsets = [1, 0, 0], sizes = [1, 8, 24], strides = [1, 1, 1]} : vector<2x8x24xf32> to vector<1x8x24xf32>
    %21 = vector.shape_cast %20 : vector<1x8x24xf32> to vector<8x24xf32>
    %22 = tpu.iota {dimensions = array<i32: 1>} : vector<1x256xi32>
    %c127_i32 = arith.constant 127 : i32
    %23 = vector.broadcast %c127_i32 : i32 to vector<1x256xi32>
    %24 = arith.andi %22, %23 : vector<1x256xi32>
    %c0_i32 = arith.constant 0 : i32
    %25 = vector.broadcast %c0_i32 : i32 to vector<1x256xi32>
    %26 = arith.cmpi eq, %24, %25 : vector<1x256xi32>
    %c127_i32_8 = arith.constant 127 : i32
    %27 = vector.broadcast %c127_i32_8 : i32 to vector<1x256xi32>
    %28 = arith.cmpi eq, %24, %27 : vector<1x256xi32>
    %c1_i32 = arith.constant 1 : i32
    %29 = tpu.dynamic_rotate %0 by %c1_i32 dim 1 : vector<8x256xf32>, i32 -> vector<8x256xf32>
    %cst = arith.constant 0.000000e+00 : f32
    %30 = vector.shape_cast %26 : vector<1x256xi1> to vector<1x256xi1>
    %31 = vector.broadcast %30 : vector<1x256xi1> to vector<8x256xi1>
    %32 = vector.broadcast %cst : f32 to vector<8x256xf32>
    %33 = arith.select %31, %32, %29 : vector<8x256xi1>, vector<8x256xf32>
    %c255_i32 = arith.constant 255 : i32
    %34 = tpu.dynamic_rotate %0 by %c255_i32 dim 1 : vector<8x256xf32>, i32 -> vector<8x256xf32>
    %cst_9 = arith.constant 0.000000e+00 : f32
    %35 = vector.shape_cast %28 : vector<1x256xi1> to vector<1x256xi1>
    %36 = vector.broadcast %35 : vector<1x256xi1> to vector<8x256xi1>
    %37 = vector.broadcast %cst_9 : f32 to vector<8x256xf32>
    %38 = arith.select %36, %37, %34 : vector<8x256xi1>, vector<8x256xf32>
    %39 = tpu.concatenate %33, %0, %38 in 0 : vector<8x256xf32>, vector<8x256xf32>, vector<8x256xf32> -> vector<24x256xf32>
    %cst_10 = arith.constant dense<0.000000e+00> : vector<8x256xf32>
    %40 = tpu.matmul %19, %39, %cst_10 {dimension_numbers = #tpu.dot_dimension_numbers<[1], [0], [0], [1], [0, 0, 1, 1], [], []>} : vector<8x24xf32>, vector<24x256xf32>, vector<8x256xf32> -> vector<8x256xf32>
    %41 = vector.broadcast %7 : vector<8x1xf32> to vector<8x256xf32>
    %42 = arith.addf %40, %41 : vector<8x256xf32>
    %43 = vector.broadcast %9 : vector<8x1xf32> to vector<8x256xf32>
    %44 = vector.broadcast %1 : vector<1x256xf32> to vector<8x256xf32>
    %45 = arith.mulf %43, %44 : vector<8x256xf32>
    %46 = arith.addf %42, %45 : vector<8x256xf32>
    %cst_11 = arith.constant 2.000000e-01 : f32
    %47 = vector.broadcast %cst_11 : f32 to vector<8x256xf32>
    %48 = arith.mulf %47, %46 : vector<8x256xf32>
    %49 = arith.maximumf %46, %48 : vector<8x256xf32>
    %50 = vector.shape_cast %49 : vector<8x256xf32> to vector<8x2x128xf32>
    %cst_12 = arith.constant dense<0.000000e+00> : vector<8x2xf32>
    %51 = vector.multi_reduction <add>, %50, %cst_12 [2] : vector<8x2x128xf32> to vector<8x2xf32>
    %52 = vector.shape_cast %51 : vector<8x2xf32> to vector<8x2x1xf32>
    %cst_13 = arith.constant 1.280000e+02 : f32
    %53 = vector.broadcast %cst_13 : f32 to vector<8x2x1xf32>
    %54 = arith.divf %52, %53 : vector<8x2x1xf32>
    %55 = arith.mulf %50, %50 : vector<8x2x128xf32>
    %cst_14 = arith.constant dense<0.000000e+00> : vector<8x2xf32>
    %56 = vector.multi_reduction <add>, %55, %cst_14 [2] : vector<8x2x128xf32> to vector<8x2xf32>
    %57 = vector.shape_cast %56 : vector<8x2xf32> to vector<8x2x1xf32>
    %cst_15 = arith.constant 1.280000e+02 : f32
    %58 = vector.broadcast %cst_15 : f32 to vector<8x2x1xf32>
    %59 = arith.divf %57, %58 : vector<8x2x1xf32>
    %60 = arith.mulf %54, %54 : vector<8x2x1xf32>
    %61 = arith.subf %59, %60 : vector<8x2x1xf32>
    %cst_16 = arith.constant 0.000000e+00 : f32
    %62 = vector.broadcast %cst_16 : f32 to vector<8x2x1xf32>
    %63 = arith.maximumf %61, %62 : vector<8x2x1xf32>
    %64 = vector.broadcast %54 : vector<8x2x1xf32> to vector<8x2x128xf32>
    %65 = arith.subf %50, %64 : vector<8x2x128xf32>
    %cst_17 = arith.constant 9.99999974E-6 : f32
    %66 = vector.broadcast %cst_17 : f32 to vector<8x2x1xf32>
    %67 = arith.addf %63, %66 : vector<8x2x1xf32>
    %68 = math.rsqrt %67 : vector<8x2x1xf32>
    %69 = vector.broadcast %68 : vector<8x2x1xf32> to vector<8x2x128xf32>
    %70 = arith.mulf %65, %69 : vector<8x2x128xf32>
    %71 = vector.broadcast %14 : vector<8x2x1xf32> to vector<8x2x128xf32>
    %72 = arith.mulf %71, %70 : vector<8x2x128xf32>
    %73 = vector.broadcast %15 : vector<8x2x1xf32> to vector<8x2x128xf32>
    %74 = arith.addf %72, %73 : vector<8x2x128xf32>
    %75 = vector.shape_cast %74 : vector<8x2x128xf32> to vector<8x256xf32>
    %c1_i32_18 = arith.constant 1 : i32
    %76 = tpu.dynamic_rotate %75 by %c1_i32_18 dim 1 : vector<8x256xf32>, i32 -> vector<8x256xf32>
    %cst_19 = arith.constant 0.000000e+00 : f32
    %77 = vector.shape_cast %26 : vector<1x256xi1> to vector<1x256xi1>
    %78 = vector.broadcast %77 : vector<1x256xi1> to vector<8x256xi1>
    %79 = vector.broadcast %cst_19 : f32 to vector<8x256xf32>
    %80 = arith.select %78, %79, %76 : vector<8x256xi1>, vector<8x256xf32>
    %c255_i32_20 = arith.constant 255 : i32
    %81 = tpu.dynamic_rotate %75 by %c255_i32_20 dim 1 : vector<8x256xf32>, i32 -> vector<8x256xf32>
    %cst_21 = arith.constant 0.000000e+00 : f32
    %82 = vector.shape_cast %28 : vector<1x256xi1> to vector<1x256xi1>
    %83 = vector.broadcast %82 : vector<1x256xi1> to vector<8x256xi1>
    %84 = vector.broadcast %cst_21 : f32 to vector<8x256xf32>
    %85 = arith.select %83, %84, %81 : vector<8x256xi1>, vector<8x256xf32>
    %86 = tpu.concatenate %80, %75, %85 in 0 : vector<8x256xf32>, vector<8x256xf32>, vector<8x256xf32> -> vector<24x256xf32>
    %cst_22 = arith.constant dense<0.000000e+00> : vector<8x256xf32>
    %87 = tpu.matmul %21, %86, %cst_22 {dimension_numbers = #tpu.dot_dimension_numbers<[1], [0], [0], [1], [0, 0, 1, 1], [], []>} : vector<8x24xf32>, vector<24x256xf32>, vector<8x256xf32> -> vector<8x256xf32>
    %88 = vector.broadcast %11 : vector<8x1xf32> to vector<8x256xf32>
    %89 = arith.addf %87, %88 : vector<8x256xf32>
    %90 = vector.broadcast %13 : vector<8x1xf32> to vector<8x256xf32>
    %91 = vector.broadcast %1 : vector<1x256xf32> to vector<8x256xf32>
    %92 = arith.mulf %90, %91 : vector<8x256xf32>
    %93 = arith.addf %89, %92 : vector<8x256xf32>
    %cst_23 = arith.constant 2.000000e-01 : f32
    %94 = vector.broadcast %cst_23 : f32 to vector<8x256xf32>
    %95 = arith.mulf %94, %93 : vector<8x256xf32>
    %96 = arith.maximumf %93, %95 : vector<8x256xf32>
    %97 = vector.shape_cast %96 : vector<8x256xf32> to vector<8x2x128xf32>
    %cst_24 = arith.constant dense<0.000000e+00> : vector<8x2xf32>
    %98 = vector.multi_reduction <add>, %97, %cst_24 [2] : vector<8x2x128xf32> to vector<8x2xf32>
    %99 = vector.shape_cast %98 : vector<8x2xf32> to vector<8x2x1xf32>
    %cst_25 = arith.constant 1.280000e+02 : f32
    %100 = vector.broadcast %cst_25 : f32 to vector<8x2x1xf32>
    %101 = arith.divf %99, %100 : vector<8x2x1xf32>
    %102 = arith.mulf %97, %97 : vector<8x2x128xf32>
    %cst_26 = arith.constant dense<0.000000e+00> : vector<8x2xf32>
    %103 = vector.multi_reduction <add>, %102, %cst_26 [2] : vector<8x2x128xf32> to vector<8x2xf32>
    %104 = vector.shape_cast %103 : vector<8x2xf32> to vector<8x2x1xf32>
    %cst_27 = arith.constant 1.280000e+02 : f32
    %105 = vector.broadcast %cst_27 : f32 to vector<8x2x1xf32>
    %106 = arith.divf %104, %105 : vector<8x2x1xf32>
    %107 = arith.mulf %101, %101 : vector<8x2x1xf32>
    %108 = arith.subf %106, %107 : vector<8x2x1xf32>
    %cst_28 = arith.constant 0.000000e+00 : f32
    %109 = vector.broadcast %cst_28 : f32 to vector<8x2x1xf32>
    %110 = arith.maximumf %108, %109 : vector<8x2x1xf32>
    %111 = vector.broadcast %101 : vector<8x2x1xf32> to vector<8x2x128xf32>
    %112 = arith.subf %97, %111 : vector<8x2x128xf32>
    %cst_29 = arith.constant 9.99999974E-6 : f32
    %113 = vector.broadcast %cst_29 : f32 to vector<8x2x1xf32>
    %114 = arith.addf %110, %113 : vector<8x2x1xf32>
    %115 = math.rsqrt %114 : vector<8x2x1xf32>
    %116 = vector.broadcast %115 : vector<8x2x1xf32> to vector<8x2x128xf32>
    %117 = arith.mulf %112, %116 : vector<8x2x128xf32>
    %118 = vector.broadcast %16 : vector<8x2x1xf32> to vector<8x2x128xf32>
    %119 = arith.mulf %118, %117 : vector<8x2x128xf32>
    %120 = vector.broadcast %17 : vector<8x2x1xf32> to vector<8x2x128xf32>
    %121 = arith.addf %119, %120 : vector<8x2x128xf32>
    %122 = vector.shape_cast %121 : vector<8x2x128xf32> to vector<8x256xf32>
    %c0_30 = arith.constant 0 : index
    %c0_31 = arith.constant 0 : index
    %123 = vector.load %arg5[%c0_30, %c0_31] : memref<8x256xf32, #tpu.memory_space<vmem>>, vector<8x256xf32>
    tpu.vector_store %arg5[%c0_30, %c0_31], %122 {strides = array<i32>} : memref<8x256xf32, #tpu.memory_space<vmem>>, vector<8x256xf32>,
    return
  }
  func.func @transform_0(%arg0: i32) -> (i32, i32) {
    %c0_i32 = arith.constant 0 : i32
    %c0_i32_0 = arith.constant 0 : i32
    return %c0_i32, %arg0 : i32, i32
  }
  func.func @transform_1(%arg0: i32) -> (i32, i32) {
    %c0_i32 = arith.constant 0 : i32
    %c0_i32_0 = arith.constant 0 : i32
    return %c0_i32, %arg0 : i32, i32
  }
  func.func @transform_2(%arg0: i32) -> (i32, i32, i32) {
    %c0_i32 = arith.constant 0 : i32
    %c0_i32_0 = arith.constant 0 : i32
    %c0_i32_1 = arith.constant 0 : i32
    %c0_i32_2 = arith.constant 0 : i32
    return %c0_i32, %c0_i32_0, %c0_i32_1 : i32, i32, i32
  }
  func.func @transform_3(%arg0: i32) -> (i32, i32, i32) {
    %c0_i32 = arith.constant 0 : i32
    %c0_i32_0 = arith.constant 0 : i32
    %c0_i32_1 = arith.constant 0 : i32
    %c0_i32_2 = arith.constant 0 : i32
    return %c0_i32, %c0_i32_0, %c0_i32_1 : i32, i32, i32
  }
  func.func @transform_4(%arg0: i32) -> (i32, i32) {
    %c0_i32 = arith.constant 0 : i32
    %c0_i32_0 = arith.constant 0 : i32
    return %c0_i32, %arg0 : i32, i32
  }
}

</mosaic_0001>

<bundles_post_ra>
// kernel: tpu_custom_call.1
= control target key start
LH: loop header
LB: loop body
LE: loop exit
PB: predicated region body
PF: predicated region fallthrough
CT: control target
= control target key end

     0   :  { %9 = vsyncpa [#allocation3], 0  ;;  %s2143_s0 = inlined_call_operand.hbm [shape: f32[8,256], index: 0, kind: input, shape index: {}]   ;;  %s2144_s1 = inlined_call_operand.vmem [shape: f32[1,256], index: 1, kind: input, shape index: {}]   ;;  %s2145_s2 = inlined_call_operand.hbm [shape: f32[2,8,24], index: 2, kind: input, shape index: {}]   ;;  %s2146_s3 = inlined_call_operand.hbm [shape: f32[8,2,8], index: 3, kind: input, shape index: {}]   ;;  %s2147_s4 = inlined_call_operand.hbm [shape: f32[8,256], index: 4, kind: output, shape index: {}]  }
   0x1   :  { %10 = vsyncpa [#allocation6], 0 }
   0x2   :  { %11 = vsyncpa [#allocation4], 0  ;;  %s1463_s15 = smov [#allocation5]   ;;  %s1369_s19 = scalar_lea.hbm %s2145_s2, 256 }
   0x3   :  { %s29_s16 = sshll.u32 %s1463_s15, 4  ;;  %p1370_p0 = scmp.ne.s32.totalorder %s2145_s2, %s1369_s19  ;;  %s30_s16 = int_to_ptr.vmem [resolvable:$true] %s29_s16 }
   0x4   :  { %p1373_p1 = scmp.lt.u32.totalorder %s1369_s19, %s2145_s2 }
   0x6   :  { %p1375_p2 = pnand %p1373_p1, %p1370_p0 }
   0x8   :  { %1378 = shalt.err (!%p1375_p2)
}
   0x9   :  { %s1379_s24 = scalar_lea.vmem %s30_s16, 256  ;;  %p1384_p4 = scmp.lt.s32.totalorder %s30_s16, %s30_s16 }
   0xa   :  { %p1380_p3 = scmp.ne.s32.totalorder %s30_s16, %s1379_s24  ;;  %p1385_p5 = scmp.lt.s32.totalorder %s1379_s24, %s1379_s24 }
   0xc   :  { %p1386_p6 = por %p1385_p5, %p1384_p4 }
   0xe   :  { %p1387_p7 = pnand %p1386_p6, %p1380_p3 }
  0x10   :  { %1390 = shalt.err (!%p1387_p7)
}
  0x11   :  { %s1464_s25 = smov 128   ;;  %s1465_s26 = smov 8  }
  0x12   :  { %35 = dma.hbm_to_vmem [thread:$0]  %s2145_s2, 256, %s30_s16, [#allocation6], %s1464_s25, %s1464_s25, %s1465_s26  }
  0x13   :  { %s1466_s29 = smov [#allocation2]   ;;  %s1467_s5 = smov [#allocation7]  }
  0x14   :  { %s18_s30 = sshll.u32 %s1466_s29, 4  ;;  %s41_s6 = sshll.u32 %s1467_s5, 4  ;;  %s19_s30 = int_to_ptr.vmem [resolvable:$true] %s18_s30  ;;  %s42_s6 = int_to_ptr.vmem [resolvable:$true] %s41_s6 }
  0x15   :  { %s1391_s9 = scalar_lea.hbm %s2143_s0, 256 }
  0x16   :  { %p1392_p8 = scmp.ne.s32.totalorder %s2143_s0, %s1391_s9  ;;  %p1395_p9 = scmp.lt.u32.totalorder %s1391_s9, %s2143_s0 }
  0x18   :  { %p1397_p10 = pnand %p1395_p9, %p1392_p8 }
  0x1a   :  { %1400 = shalt.err (!%p1397_p10)
}
  0x1b   :  { %s1401_s2 = scalar_lea.vmem %s19_s30, 256  ;;  %p1406_p12 = scmp.lt.s32.totalorder %s19_s30, %s19_s30 }
  0x1c   :  { %p1402_p11 = scmp.ne.s32.totalorder %s19_s30, %s1401_s2  ;;  %p1407_p13 = scmp.lt.s32.totalorder %s1401_s2, %s1401_s2 }
  0x1e   :  { %p1408_p0 = por %p1407_p13, %p1406_p12 }
  0x20   :  { %p1409_p1 = pnand %p1408_p0, %p1402_p11 }
  0x22   :  { %1412 = shalt.err (!%p1409_p1)
}
  0x23   :  { %21 = dma.hbm_to_vmem [thread:$0]  %s2143_s0, 256, %s19_s30, [#allocation3]  }
  0x24   :  { %s1413_s18 = scalar_lea.hbm %s2146_s3, 256 }
  0x25   :  { %p1414_p2 = scmp.ne.s32.totalorder %s2146_s3, %s1413_s18  ;;  %p1417_p3 = scmp.lt.u32.totalorder %s1413_s18, %s2146_s3 }
  0x27   :  { %p1419_p4 = pnand %p1417_p3, %p1414_p2 }
  0x29   :  { %1422 = shalt.err (!%p1419_p4)
}
  0x2a   :  { %s1423_s23 = scalar_lea.vmem %s42_s6, 256  ;;  %p1428_p6 = scmp.lt.s32.totalorder %s42_s6, %s42_s6 }
  0x2b   :  { %p1424_p5 = scmp.ne.s32.totalorder %s42_s6, %s1423_s23  ;;  %p1429_p7 = scmp.lt.s32.totalorder %s1423_s23, %s1423_s23 }
  0x2d   :  { %p1430_p8 = por %p1429_p7, %p1428_p6 }
  0x2f   :  { %p1431_p9 = pnand %p1430_p8, %p1424_p5 }
  0x31   :  { %1434 = shalt.err (!%p1431_p9)
}
  0x32   :  { %s1468_s0 = smov 32   ;;  %s1469_s24 = smov 2  }
  0x33   :  { %47 = dma.hbm_to_vmem [thread:$0]  %s2146_s3, 256, %s42_s6, [#allocation6], %s1468_s0, %s1468_s0, %s1469_s24  }
  0x34   :  { %1457 = dma.done.wait [#allocation3], 256  }
  0x35   :  { %1458 = vsyncadd [#allocation3], 4294967040 }
  0x36   :  { %1459 = dma.done.wait [#allocation6], 512  }
  0x37   :  { %1460 = vsyncadd [#allocation6], 4294966784  ;;  %v1470_v0 = vmov 0   ;;  %v1546_v1 = vld [vmem:[#allocation2] sm:$0xff]  ;;  %v1548_v2 = vld [vmem:[#allocation2 + $0x8] sm:$0xff]  ;;  %v2148_v3 = vmov 0.0   ;;  %v72_v16 = vlaneseq }
  0x38   :  { %1305 = vset.pattern.permute.xlu1 %v1470_v0  ;;  %1307 = vset.pattern.permute.xlu0 %v1470_v0  ;;  %v1300_v4 = vpack.i.bf16 %v1548_v2, %v1546_v1  ;;  %s1472_s3 = smov 127   ;;  %v1556_v5 = vld [vmem:[#allocation7 + $0x2] sm:$0x3]  ;;  %s1473_s27 = smov 1   ;;  %v1560_v6 = vld [vmem:[#allocation7 + $0x4] sm:$0x3] }
  0x39   :  { %229 = vmatprep.mubr.f32.mxu0 %v2148_v3  ;;  %795 = vmatprep.mubr.f32.mxu1 %v2148_v3  ;;  %v1565_v7 = vld [vmem:[#allocation7] sm:$0x3]  ;;  %v1474_v8 = vmov 1   ;;  %v1569_v9 = vld [vmem:[#allocation7 + $0xa] sm:$0x3]  ;;  %v1475_v13 = vmov 4  }
  0x3a   :  { %96 = vrot.lane.b32.xlu1 %v1548_v2, %s1472_s3  ;;  %1301 = vrot.lane.b32.xlu0 %v1300_v4, %s1473_s27  ;;  %v1572_v10 = vld [vmem:[#allocation7 + $0x6] sm:$0x3]  ;;  %v1578_v11 = vld [vmem:[#allocation7 + $0x8] sm:$0x3]  ;;  %v1580_v12 = vld [vmem:[#allocation7 + $0xc] sm:$0x3] }
  0x3b   :  { %v1588_v14 = vld [vmem:[#allocation7 + $0xe] sm:$0x3]  ;;  %v1476_v15 = vmov 5   ;;  %v1605_v17 = vand.u32 127, %v72_v16  ;;  %vm1477_vm4 = vmmov 1   ;;  %v2158_v29 = vmov 0 }
  0x3c   :  { %v2161_v32 = vmov 0  ;;  %v60_v34 = vld [vmem:[#allocation5] sm:$0xff]  ;;  %vm161_vm9 = vcmask 195584   ;;  %v1643_v42 = vshrl.u32 %v72_v16, 7  ;;  %v59_v45 = vld [vmem:[%s2144_s1] sm:$0x3] }
  0x3d   :  { %v74_v18 = vadd.s32 128, %v1605_v17  ;;  %vm85_vm0 = vcmp.lt.s32.totalorder %v1605_v17, 1  ;;  %vm1263_vm2 = vcmp.ne.s32.totalorder %v1605_v17, 0  ;;  %vm98_vm3 = vcmp.lt.s32.totalorder %v1605_v17, 127  ;;  %s1484_s1 = smov [#allocation8]  }
  0x3e   :  { %113 = vperm.xlu1 %1305, %v1556_v5   ;;  %94 = vrot.lane.b32.xlu0 %v1546_v1, %s1472_s3  ;;  %vm1621_vm6 = vmpackc.low %vm1477_vm4, %vm1263_vm2  ;;  %vm1265_vm8 = vcmp.ne.s32.totalorder %v1605_v17, 127  ;;  %v271_v44 = vsub.s32 0, %v1643_v42  ;;  %v275_v46 = vsub.s32 1, %v1643_v42  ;;  %vm140_vm10 = vcmask 1041409   ;;  %s1234_s30 = sshll.u32 %s1484_s1, 4  ;;  %s1235_s30 = int_to_ptr.vmem [resolvable:$true] %s1234_s30 }
  0x3f   :  { %v76_v19 = vand.u32 127, %v74_v18  ;;  %v2159_v29 = vsel %vm1621_vm6, 4294967295, %v2158_v29  ;;  %vm143_vm11 = vcmask 1042434   ;;  %vm146_vm12 = vcmask 1043459   ;;  %s1435_s5 = scalar_lea.vmem %s1235_s30, 256  ;;  %p1440_p11 = scmp.lt.s32.totalorder %s1235_s30, %s1235_s30 }
  0x40   :  { %2160 = vst [vmem:[#allocation12_spill] sm:$0xff] %v2159_v29  ;;  %v1650_v48 = vrot.slane %v59_v45, %v271_v44  ;;  %v1652_v49 = vrot.slane %v59_v45, %v275_v46  ;;  %vm149_vm13 = vcmask 1044484   ;;  %vm152_vm14 = vcmask 1045509   ;;  %p1436_p10 = scmp.ne.s32.totalorder %s1235_s30, %s1435_s5  ;;  %p1441_p12 = scmp.lt.s32.totalorder %s1435_s5, %s1435_s5 }
  0x41   :  { %vm1262_vm1 = vcmp.ne.s32.totalorder %v76_v19, 0  ;;  %vm1627_vm7 = vcmp.ne.s32.totalorder %v76_v19, 127  ;;  %vm155_vm15 = vcmask 1046534   ;;  %vm413_vm2 = vcmask 1041408  }
  0x42   :  { %117 = vperm.xlu1 %1305, %v1560_v6   ;;  %109 = vperm.xlu0 %1307, %v1565_v7   ;;  %vm1613_vm5 = vmpackc.low %vm1477_vm4, %vm1262_vm1  ;;  %v2162_v32 = vsel %vm1627_vm7, 4294967295, %v2161_v32  ;;  %2164 = vst [vmem:[#allocation14_spill] sm:$0xff] %v1650_v48  ;;  %vm158_vm1 = vcmask 1047559   ;;  %p1442_p13 = por %p1441_p12, %p1440_p11 }
  0x43   :  { %2163 = vst [vmem:[#allocation13_spill] sm:$0xff] %v2162_v32  ;;  %2165 = vst [vmem:[#allocation15_spill] sm:$0xff] %v1652_v49 }
  0x44   :  { %p1443_p0 = pnand %p1442_p13, %p1436_p10 }
  0x46   :  { %1306 = vset.pattern.permute.xlu1 %v1474_v8  ;;  %129 = vperm.xlu0 %1307, %v1569_v9  }
  0x47   :  { %245 = vperm.xlu1 %1306, %v1560_v6  }
  0x4a   :  { %1312 = vset.pattern.permute.xlu0 %v1474_v8 }
  0x4b   :  { %1308 = vset.pattern.permute.xlu1 %v1470_v0  ;;  %241 = vperm.xlu0 %1312, %v1556_v5  }
  0x4c   :  { %121 = vperm.xlu1 %1308, %v1572_v10  }
  0x4f   :  { %249 = vperm.xlu0 %1312, %v1572_v10  }
  0x50   :  { %1309 = vset.pattern.permute.xlu1 %v1474_v8 }
  0x51   :  { %237 = vperm.xlu1 %1309, %v1565_v7  }
  0x53   :  { %261 = vperm.xlu0 %1312, %v1580_v12  }
  0x55   :  { %1310 = vset.pattern.permute.xlu1 %v1470_v0 }
  0x56   :  { %125 = vperm.xlu1 %1310, %v1578_v11  }
  0x57   :  { %1316 = vset.pattern.permute.xlu0 %v1475_v13 }
  0x58   :  { %548 = vperm.xlu0 %1316, %v1556_v5  }
  0x5a   :  { %1311 = vset.pattern.permute.xlu1 %v1474_v8 }
  0x5b   :  { %253 = vperm.xlu1 %1311, %v1578_v11  }
  0x5c   :  { %1318 = vset.pattern.permute.xlu0 %v1476_v15 }
  0x5d   :  { %592 = vperm.xlu0 %1318, %v1560_v6  }
  0x5f   :  { %257 = vperm.xlu1 %1311, %v1569_v9  }
  0x61   :  { %604 = vperm.xlu0 %1318, %v1569_v9  }
  0x63   :  { %1313 = vset.pattern.permute.xlu1 %v1470_v0 }
  0x64   :  { %133 = vperm.xlu1 %1313, %v1580_v12  }
  0x68   :  { %137 = vperm.xlu1 %1313, %v1588_v14  }
  0x6c   :  { %1314 = vset.pattern.permute.xlu1 %v1474_v8 }
  0x6d   :  { %265 = vperm.xlu1 %1314, %v1588_v14  }
  0x71   :  { %1315 = vset.pattern.permute.xlu1 %v1475_v13 }
  0x72   :  { %544 = vperm.xlu1 %1315, %v1565_v7  }
  0x76   :  { %552 = vperm.xlu1 %1315, %v1560_v6  }
  0x7a   :  { %556 = vperm.xlu1 %1315, %v1572_v10  }
  0x7e   :  { %560 = vperm.xlu1 %1315, %v1578_v11  }
  0x82   :  { %564 = vperm.xlu1 %1315, %v1569_v9  }
  0x86   :  { %568 = vperm.xlu1 %1315, %v1580_v12  }
  0x8a   :  { %572 = vperm.xlu1 %1315, %v1588_v14  }
  0x8e   :  { %1317 = vset.pattern.permute.xlu1 %v1476_v15 }
  0x8f   :  { %584 = vperm.xlu1 %1317, %v1565_v7  }
  0x93   :  { %588 = vperm.xlu1 %1317, %v1556_v5  }
  0x97   :  { %596 = vperm.xlu1 %1317, %v1572_v10  }
  0x9b   :  { %600 = vperm.xlu1 %1317, %v1578_v11  }
  0xac   :  { %v1302_v20 = vpop.permute.xlu0 %1301  ;;  %v97_v23 = vpop.permute.xlu1 %96 }
  0xad   :  { %v1304_v21 = vunpack.i.h.bf16 %v1302_v20  ;;  %v1303_v22 = vunpack.i.l.bf16 %v1302_v20 }
  0xaf   :  { %v86_v24 = vsel %vm85_vm0, %v1303_v22, %v1304_v21  ;;  %v87_v26 = vsel %vm85_vm0, %v1304_v21, %v1303_v22 }
  0xb0   :  { %v1266_v27 = vpack.c.bf16 %v1548_v2, %v86_v24  ;;  %v1269_v28 = vpack.c.bf16 %v1546_v1, %v87_v26  ;;  %v95_v30 = vpop.permute.xlu0 %94 }
  0xb1   :  { %v100_v31 = vsel %vm98_vm3, %v97_v23, %v95_v30  ;;  %v99_v33 = vsel %vm98_vm3, %v95_v30, %v97_v23 }
  0xb2   :  { %1268 = vmatprep.subr.msk.bf16.mxu0 %vm1613_vm5, %v1266_v27 }
  0xb3   :  { %1271 = vmatpush1.bf16.msk.msra.mxu0 %vm1621_vm6, %v1269_v28 }
  0xb4   :  { %1249 = vmatprep.subr.msk.mxu0 %vm1627_vm7, %v100_v31 }
  0xb7   :  { %1251 = vmatpush1.msk.msra.mxu0 %vm1265_vm8, %v99_v33 }
  0xb8   :  { %1252 = vmatmul.mubr.msk.f32.vlgmr.msra.gmra.mrb[0].mxu0 %vm161_vm9, %v60_v34 }
  0xbd   :  { %v114_v35 = vpop.permute.xlu1 %113 }
  0xbe   :  { %v139_v54 = vrot.slane %v114_v35, 7 }
  0xc1   :  { %v118_v36 = vpop.permute.xlu1 %117  ;;  %v110_v40 = vpop.permute.xlu0 %109 }
  0xc2   :  { %v142_v60 = vrot.slane %v118_v36, 6  ;;  %v141_v0 = vsel %vm140_vm10, %v139_v54, %v110_v40 }
  0xc4   :  { %v144_v18 = vsel %vm143_vm11, %v142_v60, %v141_v0 }
  0xc5   :  { %v130_v43 = vpop.permute.xlu0 %129 }
  0xc6   :  { %v246_v37 = vpop.permute.xlu1 %245  ;;  %v151_v36 = vrot.slane %v130_v43, 3 }
  0xc7   :  { %v283_v55 = vmul.f32 %v1650_v48, %v246_v37  ;;  %v284_v57 = vmul.f32 %v1652_v49, %v246_v37 }
  0xc9   :  { %v313_v2 = vrot.slane %v283_v55, 6  ;;  %v327_v8 = vrot.slane %v284_v57, 6 }
  0xca   :  { %v242_v50 = vpop.permute.xlu0 %241 }
  0xcb   :  { %v122_v38 = vpop.permute.xlu1 %121  ;;  %v281_v52 = vmul.f32 %v1650_v48, %v242_v50  ;;  %v282_v53 = vmul.f32 %v1652_v49, %v242_v50 }
  0xcc   :  { %v145_v13 = vrot.slane %v122_v38, 5 }
  0xcd   :  { %v311_v59 = vrot.slane %v281_v52, 7  ;;  %v325_v63 = vrot.slane %v282_v53, 7 }
  0xce   :  { %v250_v56 = vpop.permute.xlu0 %249  ;;  %v147_v28 = vsel %vm146_vm12, %v145_v13, %v144_v18 }
  0xcf   :  { %v285_v1 = vmul.f32 %v1650_v48, %v250_v56  ;;  %v286_v4 = vmul.f32 %v1652_v49, %v250_v56 }
  0xd0   :  { %v238_v39 = vpop.permute.xlu1 %237 }
  0xd1   :  { %v279_v58 = vmul.f32 %v1650_v48, %v238_v39  ;;  %v280_v61 = vmul.f32 %v1652_v49, %v238_v39  ;;  %v315_v21 = vrot.slane %v285_v1, 5  ;;  %v329_v26 = vrot.slane %v286_v4, 5 }
  0xd2   :  { %v262_v31 = vpop.permute.xlu0 %261 }
  0xd3   :  { %v312_v15 = vsel %vm140_vm10, %v311_v59, %v279_v58  ;;  %v326_v19 = vsel %vm140_vm10, %v325_v63, %v280_v61  ;;  %v291_v40 = vmul.f32 %v1650_v48, %v262_v31  ;;  %v292_v45 = vmul.f32 %v1652_v49, %v262_v31 }
  0xd4   :  { %v314_v24 = vsel %vm143_vm11, %v313_v2, %v312_v15  ;;  %v328_v30 = vsel %vm143_vm11, %v327_v8, %v326_v19  ;;  %v1478_v58 = vmov 1983009808  }
  0xd5   :  { %v126_v41 = vpop.permute.xlu1 %125  ;;  %v316_v37 = vsel %vm146_vm12, %v315_v21, %v314_v24  ;;  %v330_v39 = vsel %vm146_vm12, %v329_v26, %v328_v30  ;;  %v321_v53 = vrot.slane %v291_v40, 2  ;;  %v335_v56 = vrot.slane %v292_v45, 2 }
  0xd6   :  { %v148_v22 = vrot.slane %v126_v41, 4  ;;  %v349_v59 = vunpack.c.l.s4 %v1478_v58 }
  0xd8   :  { %v150_v38 = vsel %vm149_vm13, %v148_v22, %v147_v28  ;;  %v350_v8 = vunpack.c.0.s8 %v349_v59 }
  0xda   :  { %v254_v47 = vpop.permute.xlu1 %253  ;;  %v1692_v24 = vsub.s32 %v350_v8, %v1643_v42 }
  0xdb   :  { %v287_v16 = vmul.f32 %v1650_v48, %v254_v47  ;;  %v288_v20 = vmul.f32 %v1652_v49, %v254_v47 }
  0xdd   :  { %v317_v33 = vrot.slane %v287_v16, 4  ;;  %v331_v35 = vrot.slane %v288_v20, 4  ;;  %v1479_v16 = vmov 1934713408  }
  0xde   :  { %v258_v51 = vpop.permute.xlu1 %257  ;;  %v380_v18 = vunpack.c.l.s4 %v1479_v16 }
  0xdf   :  { %v289_v27 = vmul.f32 %v1650_v48, %v258_v51  ;;  %v290_v34 = vmul.f32 %v1652_v49, %v258_v51  ;;  %v318_v50 = vsel %vm149_vm13, %v317_v33, %v316_v37  ;;  %v153_v51 = vsel %vm152_vm14, %v151_v36, %v150_v38 }
  0xe0   :  { %v332_v43 = vsel %vm149_vm13, %v331_v35, %v330_v39 }
  0xe1   :  { %v319_v44 = vrot.slane %v289_v27, 3  ;;  %v333_v46 = vrot.slane %v290_v34, 3  ;;  %v381_v27 = vunpack.c.0.s8 %v380_v18 }
  0xe3   :  { %v134_v62 = vpop.permute.xlu1 %133  ;;  %v320_v57 = vsel %vm152_vm14, %v319_v44, %v318_v50  ;;  %v334_v61 = vsel %vm152_vm14, %v333_v46, %v332_v43  ;;  %v1697_v35 = vsub.s32 %v381_v27, %v1643_v42 }
  0xe4   :  { %v154_v47 = vrot.slane %v134_v62, 2  ;;  %v322_v0 = vsel %vm155_vm15, %v321_v53, %v320_v57  ;;  %v336_v4 = vsel %vm155_vm15, %v335_v56, %v334_v61 }
  0xe6   :  { %v156_v60 = vsel %vm155_vm15, %v154_v47, %v153_v51 }
  0xe7   :  { %v138_v23 = vpop.permute.xlu1 %137 }
  0xe8   :  { %v157_v55 = vrot.slane %v138_v23, 1 }
  0xea   :  { %v159_v1 = vsel %vm158_vm1, %v157_v55, %v156_v60 }
  0xec   :  { %v266_v41 = vpop.permute.xlu1 %265 }
  0xed   :  { %v293_v52 = vmul.f32 %v1650_v48, %v266_v41  ;;  %v294_v54 = vmul.f32 %v1652_v49, %v266_v41 }
  0xef   :  { %v323_v62 = vrot.slane %v293_v52, 1  ;;  %v337_v63 = vrot.slane %v294_v54, 1 }
  0xf1   :  { %v324_v19 = vsel %vm158_vm1, %v323_v62, %v322_v0  ;;  %v338_v22 = vsel %vm158_vm1, %v337_v63, %v336_v4 }
 0x18b   :  { %v231_v2 = vpop.f32.mrb[0].mxu0 }
 0x18c   :  { %v232_v13 = vadd.f32 %v231_v2, %v159_v1  ;;  %v233_v15 = vpop.f32.mrb[1].mxu0 }
 0x18d   :  { %v234_v20 = vadd.f32 %v233_v15, %v159_v1 }
 0x18e   :  { %v341_v21 = vadd.f32 %v324_v19, %v232_v13 }
 0x18f   :  { %v342_v23 = vadd.f32 %v338_v22, %v234_v20 }
 0x190   :  { %v343_v26 = vmul.f32 0.2, %v341_v21 }
 0x191   :  { %v344_v28 = vmul.f32 0.2, %v342_v23 }
 0x192   :  { %v345_v30 = vmax.f32 %v341_v21, %v343_v26  ;;  %v1773_v26 = vpop.permute.xlu1 %544 }
 0x193   :  { %v346_v31 = vmax.f32 %v342_v23, %v344_v28 }
 0x194   :  { %v347_v33 = vcombine.high %v345_v30, %v2148_v3  ;;  %v354_v34 = vrot.slane %v345_v30, %v1692_v24 }
 0x195   :  { %v362_v36 = vcombine.high %v346_v31, %v2148_v3  ;;  %v369_v37 = vrot.slane %v346_v31, %v1692_v24 }
 0x196   :  { %v361_v38 = vrot.slane %v347_v33, %v1692_v24  ;;  %v1775_v27 = vpop.permute.xlu1 %552 }
 0x197   :  { %v376_v39 = vrot.slane %v362_v36, %v1692_v24  ;;  %v377_v40 = vcombine.low %v354_v34, %v369_v37  ;;  %v378_v41 = vcombine.high %v354_v34, %v369_v37  ;;  %v1789_v37 = vpop.permute.xlu0 %548 }
 0x199   :  { %v1704_v44 = vrot.slane %v377_v40, %v1697_v35  ;;  %v393_v45 = vcombine.low %v361_v38, %v376_v39  ;;  %v394_v46 = vcombine.high %v361_v38, %v376_v39  ;;  %v1713_v50 = vrot.slane %v378_v41, %v1697_v35 }
 0x19a   :  { %v1777_v28 = vpop.permute.xlu1 %556 }
 0x19b   :  { %v414_v42 = vsel %vm413_vm2, %v1704_v44, 0.0  ;;  %v1710_v47 = vcombine.high %v1704_v44, %v2148_v3  ;;  %v1718_v43 = vrot.slane %v393_v45, %v1697_v35  ;;  %v420_v52 = vsel %vm413_vm2, %v1713_v50, 0.0  ;;  %v1793_v39 = vpop.permute.xlu0 %592 }
 0x19c   :  { %415 = vadd.xlane.f32.xlu0 %v414_v42  ;;  %v1724_v53 = vcombine.high %v1713_v50, %v2148_v3  ;;  %v1729_v55 = vrot.slane %v394_v46, %v1697_v35  ;;  %v447_v59 = vmul.f32 %v1704_v44, %v1704_v44  ;;  %v449_v63 = vmul.f32 %v1713_v50, %v1713_v50 }
 0x19d   :  { %v417_v51 = vsel %vm413_vm2, %v1710_v47, 0.0  ;;  %v426_v54 = vsel %vm413_vm2, %v1718_v43, 0.0  ;;  %v1735_v57 = vcombine.high %v1718_v43, %v2148_v3  ;;  %v448_v1 = vmul.f32 %v1710_v47, %v1710_v47 }
 0x19e   :  { %418 = vadd.xlane.f32.xlu1 %v417_v51  ;;  %v423_v56 = vsel %vm413_vm2, %v1724_v53, 0.0  ;;  %v432_v58 = vsel %vm413_vm2, %v1729_v55, 0.0  ;;  %v1745_v61 = vcombine.high %v1729_v55, %v2148_v3  ;;  %v455_v62 = vsel %vm413_vm2, %v447_v59, 0.0  ;;  %v1779_v30 = vpop.permute.xlu1 %560 }
 0x19f   :  { %v429_v60 = vsel %vm413_vm2, %v1735_v57, 0.0  ;;  %v461_v2 = vsel %vm413_vm2, %v449_v63, 0.0  ;;  %v451_v4 = vmul.f32 %v1718_v43, %v1718_v43  ;;  %v458_v8 = vsel %vm413_vm2, %v448_v1, 0.0  ;;  %v1797_v41 = vpop.permute.xlu0 %604 }
 0x1a0   :  { %421 = vadd.xlane.f32.xlu0 %v420_v52  ;;  %v435_v0 = vsel %vm413_vm2, %v1745_v61, 0.0  ;;  %v450_v13 = vmul.f32 %v1724_v53, %v1724_v53  ;;  %v453_v16 = vmul.f32 %v1729_v55, %v1729_v55  ;;  %v452_v19 = vmul.f32 %v1735_v57, %v1735_v57 }
 0x1a1   :  { %v467_v15 = vsel %vm413_vm2, %v451_v4, 0.0  ;;  %v454_v22 = vmul.f32 %v1745_v61, %v1745_v61 }
 0x1a2   :  { %427 = vadd.xlane.f32.xlu1 %v426_v54  ;;  %v464_v18 = vsel %vm413_vm2, %v450_v13, 0.0  ;;  %v473_v20 = vsel %vm413_vm2, %v453_v16, 0.0  ;;  %v470_v21 = vsel %vm413_vm2, %v452_v19, 0.0  ;;  %v1781_v31 = vpop.permute.xlu1 %564 }
 0x1a3   :  { %v476_v23 = vsel %vm413_vm2, %v454_v22, 0.0 }
 0x1a4   :  { %424 = vadd.xlane.f32.xlu0 %v423_v56 }
 0x1a6   :  { %433 = vadd.xlane.f32.xlu1 %v432_v58  ;;  %v1783_v33 = vpop.permute.xlu1 %568 }
 0x1a8   :  { %430 = vadd.xlane.f32.xlu0 %v429_v60 }
 0x1aa   :  { %456 = vadd.xlane.f32.xlu1 %v455_v62  ;;  %v1785_v34 = vpop.permute.xlu1 %572 }
 0x1ac   :  { %436 = vadd.xlane.f32.xlu0 %v435_v0 }
 0x1ae   :  { %462 = vadd.xlane.f32.xlu1 %v461_v2  ;;  %v1787_v36 = vpop.permute.xlu1 %584 }
 0x1b0   :  { %459 = vadd.xlane.f32.xlu0 %v458_v8 }
 0x1b2   :  { %468 = vadd.xlane.f32.xlu1 %v467_v15  ;;  %v1791_v38 = vpop.permute.xlu1 %588 }
 0x1b4   :  { %465 = vadd.xlane.f32.xlu0 %v464_v18 }
 0x1b6   :  { %474 = vadd.xlane.f32.xlu1 %v473_v20  ;;  %v1795_v40 = vpop.permute.xlu1 %596 }
 0x1b8   :  { %471 = vadd.xlane.f32.xlu0 %v470_v21 }
 0x1ba   :  { %v1799_v45 = vpop.permute.xlu1 %600 }
 0x1bc   :  { %477 = vadd.xlane.f32.xlu0 %v476_v23 }
 0x1c7   :  { %608 = vperm.xlu1 %1317, %v1580_v12  }
 0x1d2   :  { %612 = vperm.xlu0 %1318, %v1588_v14  }
 0x229   :  { %v416_v46 = vpop.xlane.xlu0 %415 }
 0x22a   :  { %v1801_v58 = vmul.f32 0.0078125, %v416_v46 }
 0x22b   :  { %v419_v42 = vpop.xlane.xlu1 %418 }
 0x22c   :  { %v487_v0 = vmul.f32 %v1801_v58, %v1801_v58  ;;  %v1807_v2 = vmul.f32 0.0078125, %v419_v42 }
 0x22d   :  { %v422_v51 = vpop.xlane.xlu0 %421 }
 0x22e   :  { %v1803_v62 = vmul.f32 0.0078125, %v422_v51  ;;  %v488_v20 = vmul.f32 %v1807_v2, %v1807_v2 }
 0x22f   :  { %v428_v52 = vpop.xlane.xlu1 %427 }
 0x230   :  { %v1809_v4 = vmul.f32 0.0078125, %v428_v52  ;;  %v489_v15 = vmul.f32 %v1803_v62, %v1803_v62 }
 0x231   :  { %v425_v54 = vpop.xlane.xlu0 %424 }
 0x232   :  { %v1813_v18 = vmul.f32 0.0078125, %v425_v54  ;;  %v491_v23 = vmul.f32 %v1809_v4, %v1809_v4 }
 0x233   :  { %v434_v56 = vpop.xlane.xlu1 %433 }
 0x234   :  { %v1819_v51 = vmul.f32 0.0078125, %v434_v56  ;;  %v490_v54 = vmul.f32 %v1813_v18, %v1813_v18 }
 0x235   :  { %v431_v59 = vpop.xlane.xlu0 %430 }
 0x237   :  { %v457_v60 = vpop.xlane.xlu1 %456 }
 0x238   :  { %v479_v63 = vmul.f32 0.0078125, %v457_v60 }
 0x239   :  { %v437_v1 = vpop.xlane.xlu0 %436 }
 0x23a   :  { %v495_v8 = vsub.f32 %v479_v63, %v487_v0  ;;  %v1823_v0 = vmul.f32 0.0078125, %v431_v59 }
 0x23b   :  { %v463_v13 = vpop.xlane.xlu1 %462 }
 0x23c   :  { %v481_v16 = vmul.f32 0.0078125, %v463_v13  ;;  %v503_v46 = vmax.f32 %v495_v8, 0.0  ;;  %v493_v8 = vmul.f32 %v1819_v51, %v1819_v51 }
 0x23d   :  { %v460_v19 = vpop.xlane.xlu0 %459 }
 0x23e   :  { %v497_v21 = vsub.f32 %v481_v16, %v489_v15  ;;  %v480_v22 = vmul.f32 0.0078125, %v460_v19  ;;  %v519_v19 = vadd.f32 1e-05, %v503_v46 }
 0x23f   :  { %v469_v42 = vpop.xlane.xlu1 %468 }
 0x240   :  { %v505_v52 = vmax.f32 %v497_v21, 0.0  ;;  %v496_v60 = vsub.f32 %v480_v22, %v488_v20  ;;  %v483_v63 = vmul.f32 0.0078125, %v469_v42  ;;  %v492_v20 = vmul.f32 %v1823_v0, %v1823_v0 }
 0x241   :  { %v466_v13 = vpop.xlane.xlu0 %465  ;;  %v1829_v22 = vmul.f32 0.0078125, %v437_v1 }
 0x242   :  { %v521_v3 = vadd.f32 1e-05, %v505_v52  ;;  %v504_v49 = vmax.f32 %v496_v60, 0.0  ;;  %v499_v15 = vsub.f32 %v483_v63, %v491_v23  ;;  %v482_v16 = vmul.f32 0.0078125, %v466_v13 }
 0x243   :  { %v475_v48 = vpop.xlane.xlu1 %474 }
 0x244   :  { %v520_v56 = vadd.f32 1e-05, %v504_v49  ;;  %v507_v32 = vmax.f32 %v499_v15, 0.0  ;;  %v498_v21 = vsub.f32 %v482_v16, %v490_v54  ;;  %1335 = vrsqrt.f32 %v521_v3 }
 0x245   :  { %v485_v59 = vmul.f32 0.0078125, %v475_v48  ;;  %v472_v42 = vpop.xlane.xlu0 %471  ;;  %v494_v54 = vmul.f32 %v1829_v22, %v1829_v22 }
 0x246   :  { %1337 = vrsqrt.f32 %v520_v56  ;;  %v523_v52 = vadd.f32 1e-05, %v507_v32  ;;  %v506_v23 = vmax.f32 %v498_v21, 0.0  ;;  %v484_v60 = vmul.f32 0.0078125, %v472_v42 }
 0x247   :  { %1339 = vrsqrt.f32 %v519_v19  ;;  %v501_v46 = vsub.f32 %v485_v59, %v493_v8  ;;  %v513_v59 = vsub.f32 %v1713_v50, %v1803_v62  ;;  %v511_v42 = vsub.f32 %v1704_v44, %v1801_v58 }
 0x248   :  { %v522_v63 = vadd.f32 1e-05, %v506_v23  ;;  %v500_v13 = vsub.f32 %v484_v60, %v492_v20  ;;  %1341 = vrsqrt.f32 %v523_v52  ;;  %v512_v20 = vsub.f32 %v1710_v47, %v1807_v2 }
 0x249   :  { %v509_v49 = vmax.f32 %v501_v46, 0.0  ;;  %v478_v15 = vpop.xlane.xlu0 %477  ;;  %v514_v23 = vsub.f32 %v1724_v53, %v1813_v18  ;;  %v517_v47 = vsub.f32 %v1729_v55, %v1819_v51  ;;  %v516_v50 = vsub.f32 %v1735_v57, %v1823_v0 }
 0x24a   :  { %1343 = vrsqrt.f32 %v522_v63  ;;  %v508_v1 = vmax.f32 %v500_v13, 0.0  ;;  %v486_v16 = vmul.f32 0.0078125, %v478_v15  ;;  %v515_v13 = vsub.f32 %v1718_v43, %v1809_v4 }
 0x24b   :  { %v525_v3 = vadd.f32 1e-05, %v509_v49  ;;  %v518_v57 = vsub.f32 %v1745_v61, %v1829_v22 }
 0x24c   :  { %v524_v48 = vadd.f32 1e-05, %v508_v1  ;;  %v502_v29 = vsub.f32 %v486_v16, %v494_v54 }
 0x24d   :  { %1345 = vrsqrt.f32 %v525_v3 }
 0x24e   :  { %1347 = vrsqrt.f32 %v524_v48  ;;  %v510_v32 = vmax.f32 %v502_v29, 0.0  ;;  %v1336_v56 = vpop.eup %1335 }
 0x24f   :  { %v537_v60 = vmul.f32 %v1336_v56, %v513_v59 }
 0x250   :  { %v1338_v19 = vpop.eup %1337  ;;  %v526_v8 = vadd.f32 1e-05, %v510_v32 }
 0x251   :  { %v1340_v21 = vpop.eup %1339  ;;  %v536_v29 = vmul.f32 %v1338_v19, %v512_v20  ;;  %v577_v53 = vmul.f32 %v1775_v27, %v537_v60  ;;  %v613_v22 = vpop.permute.xlu0 %612  ;;  %v1483_v60 = vmov 7  }
 0x252   :  { %1349 = vrsqrt.f32 %v526_v8  ;;  %v1342_v52 = vpop.eup %1341  ;;  %v535_v63 = vmul.f32 %v1340_v21, %v511_v42  ;;  %v1480_v42 = vmov 3  }
 0x253   :  { %v539_v58 = vmul.f32 %v1342_v52, %v515_v13  ;;  %v576_v62 = vmul.f32 %v1789_v37, %v536_v29  ;;  %v617_v27 = vadd.f32 %v1793_v39, %v577_v53  ;;  %1324 = vset.pattern.permute.xlu1 %v1480_v42  ;;  %1326 = vset.pattern.permute.xlu0 %v1480_v42  ;;  %v1481_v52 = vmov 2  }
 0x254   :  { %v1344_v46 = vpop.eup %1343  ;;  %v575_v54 = vmul.f32 %v1773_v26, %v535_v63 }
 0x255   :  { %v538_v49 = vmul.f32 %v1344_v46, %v514_v23  ;;  %v579_v51 = vmul.f32 %v1779_v30, %v539_v58  ;;  %v616_v37 = vadd.f32 %v1791_v38, %v576_v62  ;;  %v1482_v23 = vmov 6  }
 0x256   :  { %v615_v1 = vadd.f32 %v1787_v36, %v575_v54 }
 0x257   :  { %v1346_v44 = vpop.eup %1345  ;;  %v578_v2 = vmul.f32 %v1777_v28, %v538_v49  ;;  %v609_v28 = vpop.permute.xlu1 %608  ;;  %v61_v49 = vld [vmem:[#allocation5 + $0x8] sm:$0xff] }
 0x258   :  { %v1348_v18 = vpop.eup %1347  ;;  %v541_v15 = vmul.f32 %v1346_v44, %v517_v47  ;;  %v623_v61 = vcombine.low %v615_v1, %v617_v27 }
 0x259   :  { %v540_v43 = vmul.f32 %v1348_v18, %v516_v50  ;;  %v618_v4 = vadd.f32 %v1795_v40, %v578_v2 }
 0x25a   :  { %v581_v55 = vmul.f32 %v1783_v33, %v541_v15  ;;  %v619_v33 = vadd.f32 %v1799_v45, %v579_v51  ;;  %v630_v36 = vrot.slane %v623_v61, %v1692_v24 }
 0x25b   :  { %v580_v3 = vmul.f32 %v1781_v31, %v540_v43  ;;  %v631_v40 = vcombine.low %v616_v37, %v618_v4  ;;  %v2168_v43 = vld [vmem:[#allocation14_spill] sm:$0xff] }
 0x25c   :  { %v1350_v0 = vpop.eup %1349  ;;  %v621_v16 = vadd.f32 %v609_v28, %v581_v55  ;;  %v2169_v55 = vld [vmem:[#allocation15_spill] sm:$0xff] }
 0x25d   :  { %v542_v26 = vmul.f32 %v1350_v0, %v518_v57  ;;  %v620_v38 = vadd.f32 %v1797_v41, %v580_v3  ;;  %v638_v39 = vrot.slane %v631_v40, %v1692_v24 }
 0x25e   :  { %v639_v30 = vcombine.low %v619_v33, %v621_v16 }
 0x25f   :  { %v582_v48 = vmul.f32 %v1785_v34, %v542_v26  ;;  %v655_v8 = vcombine.low %v630_v36, %v638_v39 }
 0x260   :  { %v646_v19 = vrot.slane %v639_v30, %v1692_v24 }
 0x261   :  { %v622_v32 = vadd.f32 %v613_v22, %v582_v48  ;;  %v662_v45 = vrot.slane %v655_v8, %v1697_v35 }
 0x263   :  { %v647_v56 = vcombine.low %v620_v38, %v622_v32 }
 0x265   :  { %v654_v31 = vrot.slane %v647_v56, %v1692_v24 }
 0x267   :  { %v663_v21 = vcombine.low %v646_v19, %v654_v31 }
 0x269   :  { %v670_v34 = vrot.slane %v663_v21, %v1697_v35 }
 0x26b   :  { %v1869_v20 = vcombine.low %v662_v45, %v670_v34  ;;  %v672_v59 = vcombine.high %v662_v45, %v670_v34 }
 0x26d   :  { %681 = vrot.lane.b32.xlu0 %v1869_v20, %s1472_s3  ;;  %v1319_v41 = vpack.i.bf16 %v672_v59, %v1869_v20 }
 0x26f   :  { %1320 = vrot.lane.b32.xlu1 %v1319_v41, %s1473_s27 }
 0x271   :  { %811 = vperm.xlu0 %1326, %v1560_v6  }
 0x273   :  { %683 = vrot.lane.b32.xlu1 %v672_v59, %s1472_s3 }
 0x275   :  { %803 = vperm.xlu0 %1326, %v1565_v7  }
 0x277   :  { %807 = vperm.xlu1 %1324, %v1556_v5  }
 0x279   :  { %823 = vperm.xlu0 %1326, %v1569_v9  }
 0x27b   :  { %1325 = vset.pattern.permute.xlu1 %v1481_v52 }
 0x27c   :  { %696 = vperm.xlu1 %1325, %v1560_v6  }
 0x27d   :  { %1329 = vset.pattern.permute.xlu0 %v1481_v52 }
 0x27e   :  { %693 = vperm.xlu0 %1329, %v1556_v5  }
 0x280   :  { %690 = vperm.xlu1 %1325, %v1565_v7  }
 0x282   :  { %702 = vperm.xlu0 %1329, %v1578_v11  }
 0x284   :  { %699 = vperm.xlu1 %1325, %v1572_v10  }
 0x286   :  { %711 = vperm.xlu0 %1329, %v1588_v14  }
 0x288   :  { %1327 = vset.pattern.permute.xlu1 %v1480_v42 }
 0x289   :  { %815 = vperm.xlu1 %1327, %v1572_v10  }
 0x28a   :  { %1331 = vset.pattern.permute.xlu0 %v1482_v23 }
 0x28b   :  { %1097 = vperm.xlu0 %1331, %v1565_v7  }
 0x28d   :  { %819 = vperm.xlu1 %1327, %v1578_v11  }
 0x28f   :  { %1333 = vset.pattern.permute.xlu0 %v1483_v60 }
 0x290   :  { %1137 = vperm.xlu0 %1333, %v1565_v7  }
 0x291   :  { %1328 = vset.pattern.permute.xlu1 %v1481_v52 }
 0x292   :  { %705 = vperm.xlu1 %1328, %v1569_v9  }
 0x294   :  { %1149 = vperm.xlu0 %1333, %v1572_v10  }
 0x296   :  { %708 = vperm.xlu1 %1328, %v1580_v12  }
 0x298   :  { %1157 = vperm.xlu0 %1333, %v1569_v9  }
 0x29a   :  { %1330 = vset.pattern.permute.xlu1 %v1480_v42 }
 0x29b   :  { %827 = vperm.xlu1 %1330, %v1580_v12  }
 0x29f   :  { %831 = vperm.xlu1 %1330, %v1588_v14  }
 0x2a3   :  { %1332 = vset.pattern.permute.xlu1 %v1482_v23 }
 0x2a4   :  { %1101 = vperm.xlu1 %1332, %v1556_v5  }
 0x2a8   :  { %1105 = vperm.xlu1 %1332, %v1560_v6  }
 0x2ac   :  { %1109 = vperm.xlu1 %1332, %v1572_v10  }
 0x2b0   :  { %1113 = vperm.xlu1 %1332, %v1578_v11  }
 0x2b4   :  { %1117 = vperm.xlu1 %1332, %v1569_v9  }
 0x2b8   :  { %1121 = vperm.xlu1 %1332, %v1580_v12  }
 0x2bc   :  { %1125 = vperm.xlu1 %1332, %v1588_v14  }
 0x2c0   :  { %1334 = vset.pattern.permute.xlu1 %v1483_v60 }
 0x2c1   :  { %1141 = vperm.xlu1 %1334, %v1556_v5  }
 0x2c5   :  { %1145 = vperm.xlu1 %1334, %v1560_v6  }
 0x2c9   :  { %1153 = vperm.xlu1 %1334, %v1578_v11  }
 0x2df   :  { %v682_v13 = vpop.permute.xlu0 %681 }
 0x2e1   :  { %v1321_v7 = vpop.permute.xlu1 %1320 }
 0x2e2   :  { %v1323_v29 = vunpack.i.h.bf16 %v1321_v7  ;;  %v1322_v46 = vunpack.i.l.bf16 %v1321_v7 }
 0x2e4   :  { %v677_v10 = vsel %vm85_vm0, %v1322_v46, %v1323_v29  ;;  %v678_v9 = vsel %vm85_vm0, %v1323_v29, %v1322_v46 }
 0x2e5   :  { %v684_v63 = vpop.permute.xlu1 %683  ;;  %v1272_v12 = vpack.c.bf16 %v672_v59, %v677_v10  ;;  %v1275_v14 = vpack.c.bf16 %v1869_v20, %v678_v9 }
 0x2e6   :  { %v686_v5 = vsel %vm98_vm3, %v684_v63, %v682_v13  ;;  %v685_v47 = vsel %vm98_vm3, %v682_v13, %v684_v63 }
 0x2e7   :  { %1274 = vmatprep.subr.msk.bf16.mxu1 %vm1613_vm5, %v1272_v12 }
 0x2e8   :  { %1277 = vmatpush1.bf16.msk.msra.mxu1 %vm1621_vm6, %v1275_v14 }
 0x2e9   :  { %1258 = vmatprep.subr.msk.mxu1 %vm1627_vm7, %v686_v5 }
 0x2ec   :  { %1260 = vmatpush1.msk.msra.mxu1 %vm1265_vm8, %v685_v47 }
 0x2ed   :  { %1261 = vmatmul.mubr.msk.f32.vlgmr.msra.gmra.mrb[0].mxu1 %vm161_vm9, %v61_v49 }
 0x2f0   :  { %v812_v62 = vpop.permute.xlu0 %811 }
 0x2f1   :  { %v838_v17 = vmul.f32 %v812_v62, %v2168_v43  ;;  %v839_v28 = vmul.f32 %v812_v62, %v2169_v55 }
 0x2f3   :  { %v868_v61 = vrot.slane %v838_v17, 6  ;;  %v882_v30 = vrot.slane %v839_v28, 6 }
 0x2f4   :  { %v804_v2 = vpop.permute.xlu0 %803 }
 0x2f5   :  { %v834_v1 = vmul.f32 %v804_v2, %v2168_v43  ;;  %v835_v3 = vmul.f32 %v804_v2, %v2169_v55 }
 0x2f6   :  { %v808_v25 = vpop.permute.xlu1 %807 }
 0x2f7   :  { %v836_v4 = vmul.f32 %v808_v25, %v2168_v43  ;;  %v837_v57 = vmul.f32 %v808_v25, %v2169_v55 }
 0x2f8   :  { %v824_v15 = vpop.permute.xlu0 %823 }
 0x2f9   :  { %v866_v0 = vrot.slane %v836_v4, 7  ;;  %v880_v16 = vrot.slane %v837_v57, 7  ;;  %v844_v59 = vmul.f32 %v824_v15, %v2168_v43  ;;  %v845_v52 = vmul.f32 %v824_v15, %v2169_v55 }
 0x2fb   :  { %v697_v50 = vpop.permute.xlu1 %696  ;;  %v867_v38 = vsel %vm140_vm10, %v866_v0, %v834_v1  ;;  %v881_v56 = vsel %vm140_vm10, %v880_v16, %v835_v3  ;;  %v874_v63 = vrot.slane %v844_v59, 3  ;;  %v888_v13 = vrot.slane %v845_v52, 3 }
 0x2fc   :  { %v715_v26 = vrot.slane %v697_v50, 6  ;;  %v869_v45 = vsel %vm143_vm11, %v868_v61, %v867_v38  ;;  %v883_v20 = vsel %vm143_vm11, %v882_v30, %v881_v56 }
 0x2fd   :  { %v694_v51 = vpop.permute.xlu0 %693 }
 0x2fe   :  { %v713_v37 = vrot.slane %v694_v51, 7 }
 0x2ff   :  { %v691_v44 = vpop.permute.xlu1 %690 }
 0x300   :  { %v714_v33 = vsel %vm140_vm10, %v713_v37, %v691_v44 }
 0x301   :  { %v703_v32 = vpop.permute.xlu0 %702  ;;  %v716_v36 = vsel %vm143_vm11, %v715_v26, %v714_v33 }
 0x302   :  { %v719_v34 = vrot.slane %v703_v32, 4 }
 0x303   :  { %v700_v58 = vpop.permute.xlu1 %699 }
 0x304   :  { %v717_v22 = vrot.slane %v700_v58, 5 }
 0x305   :  { %v712_v6 = vpop.permute.xlu0 %711 }
 0x306   :  { %v718_v41 = vsel %vm146_vm12, %v717_v22, %v716_v36  ;;  %v725_v62 = vrot.slane %v712_v6, 1 }
 0x307   :  { %v720_v10 = vsel %vm149_vm13, %v719_v34, %v718_v41 }
 0x308   :  { %v816_v53 = vpop.permute.xlu1 %815 }
 0x309   :  { %v840_v40 = vmul.f32 %v816_v53, %v2168_v43  ;;  %v841_v48 = vmul.f32 %v816_v53, %v2169_v55 }
 0x30b   :  { %v870_v31 = vrot.slane %v840_v40, 5  ;;  %v884_v21 = vrot.slane %v841_v48, 5  ;;  %v2170_v40 = vmov 0.0  }
 0x30c   :  { %v820_v18 = vpop.permute.xlu1 %819 }
 0x30d   :  { %v842_v39 = vmul.f32 %v820_v18, %v2168_v43  ;;  %v843_v8 = vmul.f32 %v820_v18, %v2169_v55  ;;  %v871_v60 = vsel %vm146_vm12, %v870_v31, %v869_v45  ;;  %v885_v29 = vsel %vm146_vm12, %v884_v21, %v883_v20 }
 0x30f   :  { %v872_v42 = vrot.slane %v842_v39, 4  ;;  %v886_v23 = vrot.slane %v843_v8, 4 }
 0x311   :  { %v706_v54 = vpop.permute.xlu1 %705  ;;  %v873_v14 = vsel %vm149_vm13, %v872_v42, %v871_v60  ;;  %v887_v11 = vsel %vm149_vm13, %v886_v23, %v885_v29 }
 0x312   :  { %v721_v7 = vrot.slane %v706_v54, 3  ;;  %v875_v44 = vsel %vm152_vm14, %v874_v63, %v873_v14  ;;  %v889_v53 = vsel %vm152_vm14, %v888_v13, %v887_v11 }
 0x314   :  { %v722_v47 = vsel %vm152_vm14, %v721_v7, %v720_v10 }
 0x315   :  { %v709_v27 = vpop.permute.xlu1 %708 }
 0x316   :  { %v723_v5 = vrot.slane %v709_v27, 2 }
 0x318   :  { %v724_v2 = vsel %vm155_vm15, %v723_v5, %v722_v47 }
 0x319   :  { %v726_v4 = vsel %vm158_vm1, %v725_v62, %v724_v2  ;;  %v1368_v2 = vld [vmem:[#allocation7 + $0xe] sm:$0x3] }
 0x31a   :  { %v828_v19 = vpop.permute.xlu1 %827 }
 0x31b   :  { %v846_v46 = vmul.f32 %v828_v19, %v2168_v43  ;;  %v847_v12 = vmul.f32 %v828_v19, %v2169_v55 }
 0x31d   :  { %v876_v25 = vrot.slane %v846_v46, 2  ;;  %v890_v58 = vrot.slane %v847_v12, 2 }
 0x31e   :  { %v832_v9 = vpop.permute.xlu1 %831 }
 0x31f   :  { %v848_v49 = vmul.f32 %v832_v9, %v2168_v43  ;;  %v849_v50 = vmul.f32 %v832_v9, %v2169_v55  ;;  %v877_v54 = vsel %vm155_vm15, %v876_v25, %v875_v44  ;;  %v891_v57 = vsel %vm155_vm15, %v890_v58, %v889_v53  ;;  %v1367_v53 = vld [vmem:[#allocation7 + $0xc] sm:$0x3] }
 0x321   :  { %v878_v18 = vrot.slane %v848_v49, 1  ;;  %v892_v15 = vrot.slane %v849_v50, 1 }
 0x323   :  { %v879_v55 = vsel %vm158_vm1, %v878_v18, %v877_v54  ;;  %v893_v0 = vsel %vm158_vm1, %v892_v15, %v891_v57  ;;  %v2035_v18 = vpop.permute.xlu1 %1101 }
 0x327   :  { %v2037_v15 = vpop.permute.xlu1 %1105 }
 0x32b   :  { %v2039_v54 = vpop.permute.xlu1 %1109 }
 0x3c0   :  { %v797_v43 = vpop.f32.mrb[0].mxu1 }
 0x3c1   :  { %v798_v51 = vadd.f32 %v797_v43, %v726_v4  ;;  %v799_v37 = vpop.f32.mrb[1].mxu1 }
 0x3c2   :  { %v800_v17 = vadd.f32 %v799_v37, %v726_v4  ;;  %v2041_v4 = vpop.permute.xlu1 %1113 }
 0x3c3   :  { %v896_v27 = vadd.f32 %v879_v55, %v798_v51  ;;  %v2047_v51 = vpop.permute.xlu0 %1097 }
 0x3c4   :  { %v897_v28 = vadd.f32 %v893_v0, %v800_v17 }
 0x3c5   :  { %v898_v1 = vmul.f32 0.2, %v896_v27 }
 0x3c6   :  { %v899_v16 = vmul.f32 0.2, %v897_v28  ;;  %v2043_v43 = vpop.permute.xlu1 %1117 }
 0x3c7   :  { %v900_v26 = vmax.f32 %v896_v27, %v898_v1  ;;  %v2053_v17 = vpop.permute.xlu0 %1137 }
 0x3c8   :  { %v901_v3 = vmax.f32 %v897_v28, %v899_v16 }
 0x3c9   :  { %v902_v33 = vcombine.high %v900_v26, %v2170_v40  ;;  %v909_v48 = vrot.slane %v900_v26, %v1692_v24 }
 0x3ca   :  { %v917_v61 = vcombine.high %v901_v3, %v2170_v40  ;;  %v924_v22 = vrot.slane %v901_v3, %v1692_v24  ;;  %v2045_v57 = vpop.permute.xlu1 %1121 }
 0x3cb   :  { %v916_v30 = vrot.slane %v902_v33, %v1692_v24  ;;  %v2057_v0 = vpop.permute.xlu0 %1149 }
 0x3cc   :  { %v931_v38 = vrot.slane %v917_v61, %v1692_v24  ;;  %v932_v32 = vcombine.low %v909_v48, %v924_v22  ;;  %v933_v39 = vcombine.high %v909_v48, %v924_v22 }
 0x3ce   :  { %v1968_v56 = vrot.slane %v933_v39, %v1697_v35  ;;  %v1971_v36 = vrot.slane %v932_v32, %v1697_v35  ;;  %v948_v19 = vcombine.low %v916_v30, %v931_v38  ;;  %v949_v31 = vcombine.high %v916_v30, %v931_v38  ;;  %v2049_v37 = vpop.permute.xlu1 %1125 }
 0x3cf   :  { %v2061_v1 = vpop.permute.xlu0 %1157 }
 0x3d0   :  { %v974_v8 = vsel %vm413_vm2, %v1968_v56, 0.0  ;;  %v968_v21 = vsel %vm413_vm2, %v1971_v36, 0.0  ;;  %v1979_v45 = vcombine.high %v1968_v56, %v2170_v40  ;;  %v1983_v34 = vcombine.high %v1971_v36, %v2170_v40 }
 0x3d1   :  { %975 = vadd.xlane.f32.xlu0 %v974_v8  ;;  %969 = vadd.xlane.f32.xlu1 %v968_v21  ;;  %v1986_v20 = vrot.slane %v948_v19, %v1697_v35  ;;  %v1997_v52 = vrot.slane %v949_v31, %v1697_v35  ;;  %v1000_v10 = vmul.f32 %v1971_v36, %v1971_v36 }
 0x3d2   :  { %v977_v59 = vsel %vm413_vm2, %v1979_v45, 0.0  ;;  %v971_v41 = vsel %vm413_vm2, %v1983_v34, 0.0  ;;  %v1001_v9 = vmul.f32 %v1983_v34, %v1983_v34  ;;  %v1002_v14 = vmul.f32 %v1968_v56, %v1968_v56  ;;  %v2051_v55 = vpop.permute.xlu1 %1141 }
 0x3d3   :  { %v1994_v42 = vcombine.high %v1986_v20, %v2170_v40  ;;  %v980_v23 = vsel %vm413_vm2, %v1986_v20, 0.0  ;;  %v2005_v7 = vcombine.high %v1997_v52, %v2170_v40  ;;  %v986_v29 = vsel %vm413_vm2, %v1997_v52, 0.0 }
 0x3d4   :  { %v1008_v63 = vsel %vm413_vm2, %v1000_v10, 0.0  ;;  %v1011_v12 = vsel %vm413_vm2, %v1001_v9, 0.0  ;;  %v1003_v13 = vmul.f32 %v1979_v45, %v1979_v45  ;;  %v1014_v5 = vsel %vm413_vm2, %v1002_v14, 0.0 }
 0x3d5   :  { %978 = vadd.xlane.f32.xlu1 %v977_v59  ;;  %972 = vadd.xlane.f32.xlu0 %v971_v41  ;;  %v983_v60 = vsel %vm413_vm2, %v1994_v42, 0.0  ;;  %v989_v46 = vsel %vm413_vm2, %v2005_v7, 0.0  ;;  %v1004_v11 = vmul.f32 %v1986_v20, %v1986_v20  ;;  %v1005_v49 = vmul.f32 %v1994_v42, %v1994_v42 }
 0x3d6   :  { %v1017_v6 = vsel %vm413_vm2, %v1003_v13, 0.0  ;;  %v1006_v50 = vmul.f32 %v1997_v52, %v1997_v52  ;;  %v1007_v44 = vmul.f32 %v2005_v7, %v2005_v7  ;;  %v2055_v27 = vpop.permute.xlu1 %1145 }
 0x3d7   :  { %v1020_v47 = vsel %vm413_vm2, %v1004_v11, 0.0  ;;  %v1023_v25 = vsel %vm413_vm2, %v1005_v49, 0.0 }
 0x3d8   :  { %v1026_v58 = vsel %vm413_vm2, %v1006_v50, 0.0  ;;  %v1029_v62 = vsel %vm413_vm2, %v1007_v44, 0.0 }
 0x3d9   :  { %981 = vadd.xlane.f32.xlu0 %v980_v23  ;;  %984 = vadd.xlane.f32.xlu1 %v983_v60 }
 0x3da   :  { %v2059_v28 = vpop.permute.xlu1 %1153 }
 0x3dd   :  { %987 = vadd.xlane.f32.xlu0 %v986_v29  ;;  %990 = vadd.xlane.f32.xlu1 %v989_v46 }
 0x3e1   :  { %1009 = vadd.xlane.f32.xlu0 %v1008_v63  ;;  %1012 = vadd.xlane.f32.xlu1 %v1011_v12 }
 0x3e5   :  { %1015 = vadd.xlane.f32.xlu0 %v1014_v5  ;;  %1018 = vadd.xlane.f32.xlu1 %v1017_v6 }
 0x3e9   :  { %1021 = vadd.xlane.f32.xlu0 %v1020_v47  ;;  %1024 = vadd.xlane.f32.xlu1 %v1023_v25 }
 0x3ed   :  { %1027 = vadd.xlane.f32.xlu0 %v1026_v58  ;;  %1030 = vadd.xlane.f32.xlu1 %v1029_v62 }
 0x3fe   :  { %1161 = vperm.xlu1 %1334, %v1367_v53  }
 0x403   :  { %1165 = vperm.xlu0 %1333, %v1368_v2  }
 0x45e   :  { %v976_v16 = vpop.xlane.xlu0 %975  ;;  %v970_v26 = vpop.xlane.xlu1 %969 }
 0x45f   :  { %v2063_v30 = vmul.f32 0.0078125, %v970_v26  ;;  %v2067_v32 = vmul.f32 0.0078125, %v976_v16 }
 0x461   :  { %v1040_v8 = vmul.f32 %v2063_v30, %v2063_v30  ;;  %v1042_v29 = vmul.f32 %v2067_v32, %v2067_v32 }
 0x462   :  { %v979_v3 = vpop.xlane.xlu1 %978  ;;  %v973_v40 = vpop.xlane.xlu0 %972 }
 0x463   :  { %v2065_v38 = vmul.f32 0.0078125, %v973_v40  ;;  %v2069_v39 = vmul.f32 0.0078125, %v979_v3 }
 0x465   :  { %v1041_v21 = vmul.f32 %v2065_v38, %v2065_v38  ;;  %v1043_v46 = vmul.f32 %v2069_v39, %v2069_v39 }
 0x466   :  { %v982_v33 = vpop.xlane.xlu0 %981  ;;  %v985_v48 = vpop.xlane.xlu1 %984 }
 0x467   :  { %v2079_v10 = vmul.f32 0.0078125, %v982_v33  ;;  %v2081_v6 = vmul.f32 0.0078125, %v985_v48 }
 0x469   :  { %v1044_v50 = vmul.f32 %v2079_v10, %v2079_v10  ;;  %v1045_v3 = vmul.f32 %v2081_v6, %v2081_v6 }
 0x46a   :  { %v988_v61 = vpop.xlane.xlu0 %987  ;;  %v991_v22 = vpop.xlane.xlu1 %990 }
 0x46b   :  { %v2085_v44 = vmul.f32 0.0078125, %v988_v61  ;;  %v2087_v58 = vmul.f32 0.0078125, %v991_v22 }
 0x46d   :  { %v1046_v61 = vmul.f32 %v2085_v44, %v2085_v44  ;;  %v1047_v22 = vmul.f32 %v2087_v58, %v2087_v58 }
 0x46e   :  { %v1010_v19 = vpop.xlane.xlu0 %1009  ;;  %v1013_v31 = vpop.xlane.xlu1 %1012 }
 0x46f   :  { %v1032_v59 = vmul.f32 0.0078125, %v1010_v19  ;;  %v1033_v41 = vmul.f32 0.0078125, %v1013_v31 }
 0x471   :  { %v1048_v23 = vsub.f32 %v1032_v59, %v1040_v8  ;;  %v1049_v60 = vsub.f32 %v1033_v41, %v1041_v21 }
 0x472   :  { %v1016_v9 = vpop.xlane.xlu0 %1015  ;;  %v1019_v63 = vpop.xlane.xlu1 %1018 }
 0x473   :  { %v1056_v12 = vmax.f32 %v1048_v23, 0.0  ;;  %v1057_v14 = vmax.f32 %v1049_v60, 0.0  ;;  %v1034_v13 = vmul.f32 0.0078125, %v1016_v9  ;;  %v1035_v5 = vmul.f32 0.0078125, %v1019_v63 }
 0x475   :  { %v1072_v11 = vadd.f32 1e-05, %v1056_v12  ;;  %v1073_v49 = vadd.f32 1e-05, %v1057_v14  ;;  %v1050_v47 = vsub.f32 %v1034_v13, %v1042_v29  ;;  %v1051_v25 = vsub.f32 %v1035_v5, %v1043_v46 }
 0x476   :  { %v1022_v62 = vpop.xlane.xlu0 %1021  ;;  %v1025_v53 = vpop.xlane.xlu1 %1024 }
 0x477   :  { %1351 = vrsqrt.f32 %v1072_v11  ;;  %v1058_v2 = vmax.f32 %v1050_v47, 0.0  ;;  %v1059_v16 = vmax.f32 %v1051_v25, 0.0  ;;  %v1036_v26 = vmul.f32 0.0078125, %v1022_v62 }
 0x478   :  { %1353 = vrsqrt.f32 %v1073_v49  ;;  %v1037_v40 = vmul.f32 0.0078125, %v1025_v53  ;;  %v1064_v47 = vsub.f32 %v1971_v36, %v2063_v30  ;;  %v1065_v25 = vsub.f32 %v1983_v34, %v2065_v38 }
 0x479   :  { %v1074_v33 = vadd.f32 1e-05, %v1058_v2  ;;  %v1075_v48 = vadd.f32 1e-05, %v1059_v16  ;;  %v1052_v19 = vsub.f32 %v1036_v26, %v1044_v50  ;;  %v1066_v50 = vsub.f32 %v1968_v56, %v2067_v32 }
 0x47a   :  { %v1053_v31 = vsub.f32 %v1037_v40, %v1045_v3  ;;  %v1028_v8 = vpop.xlane.xlu0 %1027  ;;  %v1031_v21 = vpop.xlane.xlu1 %1030  ;;  %v1067_v53 = vsub.f32 %v1979_v45, %v2069_v39  ;;  %v1068_v36 = vsub.f32 %v1986_v20, %v2079_v10  ;;  %v1069_v38 = vsub.f32 %v1994_v42, %v2081_v6 }
 0x47b   :  { %1355 = vrsqrt.f32 %v1074_v33  ;;  %v1060_v59 = vmax.f32 %v1052_v19, 0.0  ;;  %v1038_v41 = vmul.f32 0.0078125, %v1028_v8  ;;  %v1039_v23 = vmul.f32 0.0078125, %v1031_v21 }
 0x47c   :  { %1357 = vrsqrt.f32 %v1075_v48  ;;  %v1061_v60 = vmax.f32 %v1053_v31, 0.0  ;;  %v1070_v20 = vsub.f32 %v1997_v52, %v2085_v44  ;;  %v1071_v42 = vsub.f32 %v2005_v7, %v2087_v58 }
 0x47d   :  { %v1076_v29 = vadd.f32 1e-05, %v1060_v59  ;;  %v1054_v46 = vsub.f32 %v1038_v41, %v1046_v61  ;;  %v1055_v9 = vsub.f32 %v1039_v23, %v1047_v22 }
 0x47e   :  { %v1077_v63 = vadd.f32 1e-05, %v1061_v60  ;;  %v1162_v52 = vpop.permute.xlu1 %1161 }
 0x47f   :  { %1359 = vrsqrt.f32 %v1076_v29  ;;  %v1062_v12 = vmax.f32 %v1054_v46, 0.0  ;;  %v1063_v14 = vmax.f32 %v1055_v9, 0.0 }
 0x480   :  { %1361 = vrsqrt.f32 %v1077_v63 }
 0x481   :  { %v1352_v13 = vpop.eup %1351  ;;  %v1078_v5 = vadd.f32 1e-05, %v1062_v12  ;;  %v1079_v11 = vadd.f32 1e-05, %v1063_v14 }
 0x482   :  { %v1354_v49 = vpop.eup %1353  ;;  %v1088_v2 = vmul.f32 %v1352_v13, %v1064_v47 }
 0x483   :  { %1363 = vrsqrt.f32 %v1078_v5  ;;  %v1089_v16 = vmul.f32 %v1354_v49, %v1065_v25 }
 0x484   :  { %1365 = vrsqrt.f32 %v1079_v11  ;;  %v1128_v56 = vmul.f32 %v2047_v51, %v1088_v2 }
 0x485   :  { %v1356_v62 = vpop.eup %1355  ;;  %v1129_v32 = vmul.f32 %v2035_v18, %v1089_v16 }
 0x486   :  { %v1358_v26 = vpop.eup %1357  ;;  %v1090_v3 = vmul.f32 %v1356_v62, %v1066_v50  ;;  %v1168_v51 = vadd.f32 %v2053_v17, %v1128_v56  ;;  %v1166_v17 = vpop.permute.xlu0 %1165 }
 0x487   :  { %v1091_v40 = vmul.f32 %v1358_v26, %v1067_v53  ;;  %v1169_v18 = vadd.f32 %v2051_v55, %v1129_v32 }
 0x488   :  { %v1130_v30 = vmul.f32 %v2037_v15, %v1090_v3 }
 0x489   :  { %v1360_v34 = vpop.eup %1359  ;;  %v1131_v45 = vmul.f32 %v2039_v54, %v1091_v40 }
 0x48a   :  { %v1362_v39 = vpop.eup %1361  ;;  %v1092_v33 = vmul.f32 %v1360_v34, %v1068_v36  ;;  %v1170_v19 = vadd.f32 %v2055_v27, %v1130_v30 }
 0x48b   :  { %v1093_v48 = vmul.f32 %v1362_v39, %v1069_v38  ;;  %v1171_v61 = vadd.f32 %v2057_v0, %v1131_v45 }
 0x48c   :  { %v1132_v6 = vmul.f32 %v2041_v4, %v1092_v33  ;;  %v1176_v31 = vcombine.low %v1168_v51, %v1170_v19 }
 0x48d   :  { %v1364_v15 = vpop.eup %1363  ;;  %v1133_v27 = vmul.f32 %v2043_v43, %v1093_v48  ;;  %v1184_v0 = vcombine.low %v1169_v18, %v1171_v61 }
 0x48e   :  { %v1366_v10 = vpop.eup %1365  ;;  %v1094_v54 = vmul.f32 %v1364_v15, %v1070_v20  ;;  %v1172_v7 = vadd.f32 %v2059_v28, %v1132_v6  ;;  %v1183_v59 = vrot.slane %v1176_v31, %v1692_v24 }
 0x48f   :  { %v1095_v22 = vmul.f32 %v1366_v10, %v1071_v42  ;;  %v1173_v55 = vadd.f32 %v2061_v1, %v1133_v27  ;;  %v1191_v4 = vrot.slane %v1184_v0, %v1692_v24 }
 0x490   :  { %v1134_v8 = vmul.f32 %v2045_v57, %v1094_v54 }
 0x491   :  { %v1135_v44 = vmul.f32 %v2049_v37, %v1095_v22  ;;  %v1208_v60 = vcombine.low %v1183_v59, %v1191_v4 }
 0x492   :  { %v1174_v58 = vadd.f32 %v1162_v52, %v1134_v8 }
 0x493   :  { %v1175_v21 = vadd.f32 %v1166_v17, %v1135_v44  ;;  %v1215_v37 = vrot.slane %v1208_v60, %v1697_v35 }
 0x494   :  { %v1192_v41 = vcombine.low %v1172_v7, %v1174_v58 }
 0x495   :  { %v1200_v43 = vcombine.low %v1173_v55, %v1175_v21 }
 0x496   :  { %v1199_v23 = vrot.slane %v1192_v41, %v1692_v24 }
 0x497   :  { %v1207_v57 = vrot.slane %v1200_v43, %v1692_v24 }
 0x499   :  { %v1216_v29 = vcombine.low %v1199_v23, %v1207_v57 }
 0x49b   :  { %v1223_v28 = vrot.slane %v1216_v29, %v1697_v35 }
 0x49d   :  { %v1224_v1 = vcombine.low %v1215_v37, %v1223_v28  ;;  %v1225_v46 = vcombine.high %v1215_v37, %v1223_v28 }
 0x49f   :  { %1226 = vst [vmem:[#allocation8] sm:$0xff] %v1224_v1  ;;  %1227 = vst [vmem:[#allocation8 + $0x8] sm:$0xff] %v1225_v46 }
 0x4a0   :  { %1446 = shalt.err (!%p1443_p0)
}
 0x4a1   :  { %s1447_s8 = scalar_lea.hbm %s2147_s4, 256 }
 0x4a2   :  { %p1448_p1 = scmp.ne.s32.totalorder %s2147_s4, %s1447_s8  ;;  %p1451_p2 = scmp.lt.u32.totalorder %s1447_s8, %s2147_s4 }
 0x4a4   :  { %p1453_p3 = pnand %p1451_p2, %p1448_p1 }
 0x4a6   :  { %1456 = shalt.err (!%p1453_p3)
}
 0x4a7   :  { %1237 = dma.vmem_to_hbm [thread:$0]  %s1235_s30, 256, %s2147_s4, [#allocation4]  }
 0x4a8   :  { %1461 = dma.done.wait [#allocation4], 256  }
 0x4a9   :  { %1462 = vsyncadd [#allocation4], 4294967040 }
 0x4aa   :  { %1241 = vsyncpa [#allocation3], 1 }
 0x4ab   :  { %1242 = vsyncpa [#allocation6], 1 }
 0x4ac   :  { %1243 = vsyncpa [#allocation4], 1 }

</bundles_post_ra>
